<compile_context>
chip_gen: v7x
topology: tpu7x:2x2x1
jax: 0.10.0
libtpu: 0.0.40
codegen_flags: <defaults>
</compile_context>

<pallas_src>
import functools

import jax
import jax.numpy as jnp
import numpy as np
from jax import lax
from jax.experimental import pallas as pl
from jax.experimental.pallas import tpu as pltpu

BN_EPS = 1e-5
_VMEM_LIMIT = 48 * 1024 * 1024      # <= v7x 64 MiB physical VMEM, leaves headroom


# ----------------------------------------------------------------------------
# Tile-size selection
# ----------------------------------------------------------------------------
def _pick_tile_rows(ho, wo, cin, cout, max_rows=512, target_bytes=4 << 20):
    """Output rows computed per grid step.

    Must divide `ho` and (TPU sublane tiling) be a multiple of 8 unless it covers the
    whole axis.  Picks the largest candidate whose per-step live data (tap copies +
    f32 accumulator + double-buffered output block) stays under `target_bytes`.
    """
    cands = [d for d in range(1, ho + 1)
             if ho % d == 0 and (d % 8 == 0 or d == ho)]
    bytes_per_row = wo * (3 * cin * 4 + cout * 4 + cout * 4) * 2
    best = cands[0]
    for d in cands:
        if d <= max_rows and d * bytes_per_row <= target_bytes:
            best = max(best, d)
    return best


# ----------------------------------------------------------------------------
# Kernel A: 3x3 conv (stride 1 or 2) + folded BatchNorm + ReLU
# ----------------------------------------------------------------------------
def _conv1_kernel(x_ref, w_ref, shift_ref, o_ref, *, stride, th, wo, cin, cout):
    """One (image n, output-row tile hi) step.

    stride == 1: x_ref = zero-padded input            [1, H+2, W+2, cin]
    stride == 2: x_ref = padded input packed even/odd [1, Hp/2, 2, Wp/2, 2*cin]
                 so every conv tap is a contiguous slice (no strided loads).
    w_ref:     [3, 3, cin, cout]   (BN scale folded in)
    shift_ref: [1, cout]           (beta + (bias - mean) * scale)
    o_ref:     [1, th, wo, cout]
    """
    hi = pl.program_id(1)
    h0 = hi * th
    acc = jnp.zeros((th * wo, cout), jnp.float32)

    if stride == 1:
        for ky in range(3):
            rows = x_ref[0, pl.ds(h0 + ky, th), :, :]           # [th, W+2, cin]
            for kx in range(3):
                lhs = rows[:, kx:kx + wo, :].reshape(th * wo, cin)
                acc = acc + jnp.dot(lhs, w_ref[ky, kx],
                                    preferred_element_type=jnp.float32)
    else:  # stride == 2, packed layout
        # (row-pair offset, parity) holding padded row 2*h + ky
        sel = ((0, 0), (0, 1), (1, 0))
        for ky in range(3):
            dp, par = sel[ky]
            rows = x_ref[0, pl.ds(h0 + dp, th), par:par + 1, :, :]  # [th,1,Wp2,2cin]
            rows = rows.reshape(th, -1, 2 * cin)                    # [th, Wp2, 2cin]
            # taps kx=0,1 are the lo/hi halves of pair w -> one K=2*cin dot
            lhs01 = rows[:, 0:wo, :].reshape(th * wo, 2 * cin)
            acc = acc + jnp.dot(lhs01, w_ref[ky, 0:2].reshape(2 * cin, cout),
                                preferred_element_type=jnp.float32)
            # tap kx=2 is the lo half of pair w+1            -> one K=cin dot
            lhs2 = rows[:, 1:1 + wo, 0:cin].reshape(th * wo, cin)
            acc = acc + jnp.dot(lhs2, w_ref[ky, 2],
                                preferred_element_type=jnp.float32)

    acc = acc + shift_ref[...]            # conv bias + BatchNorm, folded
    acc = jnp.maximum(acc, 0.0)           # ReLU
    o_ref[...] = acc.reshape(1, th, wo, cout).astype(o_ref.dtype)


# ----------------------------------------------------------------------------
# Kernel B: 3x3 conv (stride 1) + folded BN + residual + final ReLU, fused
# ----------------------------------------------------------------------------
def _conv2_acc(y_ref, w_ref, shift_ref, *, th, wo, c2):
    hi = pl.program_id(1)
    h0 = hi * th
    acc = jnp.zeros((th * wo, c2), jnp.float32)
    for ky in range(3):
        rows = y_ref[0, pl.ds(h0 + ky, th), :, :]               # [th, wo+2, c2]
        for kx in range(3):
            lhs = rows[:, kx:kx + wo, :].reshape(th * wo, c2)
            acc = acc + jnp.dot(lhs, w_ref[ky, kx],
                                preferred_element_type=jnp.float32)
    return acc + shift_ref[...]


def _conv2_identity_kernel(y_ref, x_ref, w_ref, shift_ref, o_ref, *, th, wo, c2):
    """out = relu(conv2_bn(y) + x)   (identity residual, stride 1)."""
    acc = _conv2_acc(y_ref, w_ref, shift_ref, th=th, wo=wo, c2=c2)
    hi = pl.program_id(1)
    h0 = hi * th
    xres = x_ref[0, pl.ds(h0 + 1, th), 1:1 + wo, :]             # [th, wo, c2]
    acc = acc + xres.reshape(th * wo, c2).astype(jnp.float32)
    o_ref[...] = jnp.maximum(acc, 0.0).reshape(1, th, wo, c2).astype(o_ref.dtype)


def _conv2_proj_kernel(y_ref, x_ref, w_ref, shift_ref, wres_ref, bres_ref, o_ref,
                       *, th, wo, c2, stride):
    """out = relu(conv2_bn(y) + (strided 1x1 conv of x) )   (projection residual)."""
    acc = _conv2_acc(y_ref, w_ref, shift_ref, th=th, wo=wo, c2=c2)
    hi = pl.program_id(1)
    h0 = hi * th
    k = wres_ref.shape[0]
    if stride == 1:
        xs = x_ref[0, pl.ds(h0 + 1, th), 1:1 + wo, :]           # [th, wo, cin]
    else:
        # packed input: tap (2h+1, 2w+1) = (row pair h, odd) x (col pair w, hi half);
        # wres_ref is zero-padded to [2*cin, c2] so no lane slicing is needed.
        xs = x_ref[0, pl.ds(h0, th), 1:2, 0:wo, :]              # [th, 1, wo, 2cin]
    res = jnp.dot(xs.reshape(th * wo, k), wres_ref[...],
                  preferred_element_type=jnp.float32) + bres_ref[...]
    o_ref[...] = jnp.maximum(acc + res, 0.0).reshape(1, th, wo, c2).astype(o_ref.dtype)


# ----------------------------------------------------------------------------
# pallas_call wrappers
# ----------------------------------------------------------------------------
def _compiler_params():
    return pltpu.CompilerParams(dimension_semantics=("parallel", "arbitrary"),
                                vmem_limit_bytes=_VMEM_LIMIT)


def _conv1(xp, w, shift, *, stride, n, ho, wo, cout, out_dtype, tile_rows=None):
    cin = w.shape[2]
    th = tile_rows or _pick_tile_rows(ho, wo, cin, cout)
    assert ho % th == 0 and (th % 8 == 0 or th == ho)
    grid = (n, ho // th)
    ndim = xp.ndim
    x_spec = pl.BlockSpec((1,) + xp.shape[1:],
                          lambda i, j, _d=ndim: (i,) + (0,) * (_d - 1))
    w_spec = pl.BlockSpec(w.shape, lambda i, j: (0, 0, 0, 0))
    s_spec = pl.BlockSpec(shift.shape, lambda i, j: (0, 0))
    o_spec = pl.BlockSpec((1, th, wo, cout), lambda i, j: (i, j, 0, 0))
    kern = functools.partial(_conv1_kernel, stride=stride, th=th, wo=wo,
                             cin=cin, cout=cout)
    return pl.pallas_call(
        kern,
        out_shape=jax.ShapeDtypeStruct((n, ho, wo, cout), out_dtype),
        grid=grid,
        in_specs=[x_spec, w_spec, s_spec],
        out_specs=o_spec,
        compiler_params=_compiler_params(),
    )(xp, w, shift)


def _conv2_res(y1p, xp, w, shift, wres, bres, *, stride, n, ho, wo, c2,
               out_dtype, tile_rows=None):
    th = tile_rows or _pick_tile_rows(ho, wo, c2, c2)
    assert ho % th == 0 and (th % 8 == 0 or th == ho)
    grid = (n, ho // th)
    xnd = xp.ndim
    y_spec = pl.BlockSpec((1, ho + 2, wo + 2, c2), lambda i, j: (i, 0, 0, 0))
    x_spec = pl.BlockSpec((1,) + xp.shape[1:],
                          lambda i, j, _d=xnd: (i,) + (0,) * (_d - 1))
    w_spec = pl.BlockSpec(w.shape, lambda i, j: (0, 0, 0, 0))
    s_spec = pl.BlockSpec(shift.shape, lambda i, j: (0, 0))
    o_spec = pl.BlockSpec((1, th, wo, c2), lambda i, j: (i, j, 0, 0))
    out_shape = jax.ShapeDtypeStruct((n, ho, wo, c2), out_dtype)

    if wres is None:
        kern = functools.partial(_conv2_identity_kernel, th=th, wo=wo, c2=c2)
        return pl.pallas_call(
            kern, out_shape=out_shape, grid=grid,
            in_specs=[y_spec, x_spec, w_spec, s_spec],
            out_specs=o_spec, compiler_params=_compiler_params(),
        )(y1p, xp, w, shift)

    kern = functools.partial(_conv2_proj_kernel, th=th, wo=wo, c2=c2, stride=stride)
    wres_spec = pl.BlockSpec(wres.shape, lambda i, j: (0, 0))
    bres_spec = pl.BlockSpec(bres.shape, lambda i, j: (0, 0))
    return pl.pallas_call(
        kern, out_shape=out_shape, grid=grid,
        in_specs=[y_spec, x_spec, w_spec, s_spec, wres_spec, bres_spec],
        out_specs=o_spec, compiler_params=_compiler_params(),
    )(y1p, xp, w, shift, wres, bres)


# ----------------------------------------------------------------------------
# Parameter folding / layout helpers
# ----------------------------------------------------------------------------
def _fold_bn(w_oihw, bias, gamma, beta, mean, var, compute_dtype):
    """Fold eval-mode BatchNorm (and the conv bias) into weights + one shift."""
    scale = gamma / jnp.sqrt(var + BN_EPS)                       # [cout]
    w_hwio = jnp.transpose(w_oihw, (2, 3, 1, 0))                 # [3,3,cin,cout]
    w_folded = (w_hwio * scale[None, None, None, :]).astype(compute_dtype)
    shift = (beta + (bias - mean) * scale).reshape(1, -1).astype(jnp.float32)
    return w_folded, shift


def _pad_input(x, stride):
    """Zero-pad; for stride 2 also repack even/odd pairs (free row-major reshape)."""
    n, h, w, c = x.shape
    if stride == 1:
        return jnp.pad(x, ((0, 0), (1, 1), (1, 1), (0, 0)))
    assert stride == 2
    ph = 1 + (h % 2)           # make padded H/W even so pairs tile exactly
    pw = 1 + (w % 2)
    xp = jnp.pad(x, ((0, 0), (1, ph), (1, pw), (0, 0)))
    hp, wp = xp.shape[1], xp.shape[2]
    return xp.reshape(n, hp // 2, 2, wp // 2, 2 * c)


# ----------------------------------------------------------------------------
# ResNet18ConvBlock forward (Pallas)
# ----------------------------------------------------------------------------
@functools.partial(jax.jit, static_argnames=("stride", "compute_dtype", "tile_rows"))
def resnet18_conv_block(x_nchw, p, *, stride, compute_dtype=jnp.bfloat16,
                        tile_rows=None):
    out_dtype = x_nchw.dtype
    x = jnp.transpose(x_nchw, (0, 2, 3, 1))                      # NCHW -> NHWC
    n, h, w, cin = x.shape
    cout = p['w1'].shape[0]
    ho = (h - 1) // stride + 1
    wo = (w - 1) // stride + 1

    # ---- kernel A: conv1 (stride s) + BN1 + ReLU ---------------------------
    w1, shift1 = _fold_bn(p['w1'], p['b1'], p['g1'], p['be1'], p['m1'], p['v1'],
                          compute_dtype)
    xp = _pad_input(x.astype(compute_dtype), stride)
    y1 = _conv1(xp, w1, shift1, stride=stride, n=n, ho=ho, wo=wo, cout=cout,
                out_dtype=compute_dtype, tile_rows=tile_rows)

    # ---- kernel B: conv2 + BN2 + residual + ReLU ---------------------------
    w2, shift2 = _fold_bn(p['w2'], p['b2'], p['g2'], p['be2'], p['m2'], p['v2'],
                          compute_dtype)
    y1p = jnp.pad(y1, ((0, 0), (1, 1), (1, 1), (0, 0)))          # bf16 intermediate

    if p.get('wres') is not None:
        wres = p['wres'][:, :, 0, 0].T.astype(compute_dtype)     # [cin, cout]
        if stride == 2:   # match the packed residual read (odd-column half)
            wres = jnp.concatenate([jnp.zeros_like(wres), wres], axis=0)
        bres = p['bres'].reshape(1, -1).astype(jnp.float32)
    else:
        if stride != 1:
            raise ValueError("identity residual requires stride == 1 "
                             "(the PyTorch module would fail here too)")
        wres, bres = None, None

    out = _conv2_res(y1p, xp, w2, shift2, wres, bres, stride=stride, n=n,
                     ho=ho, wo=wo, c2=cout, out_dtype=out_dtype,
                     tile_rows=tile_rows)
    return jnp.transpose(out, (0, 3, 1, 2))                      # NHWC -> NCHW


# ----------------------------------------------------------------------------
# Pure-JAX reference (PyTorch semantics, NCHW) for validation
# ----------------------------------------------------------------------------
def ref_block(x, p, stride):
    def conv(x, w, b, s, pad):
        y = lax.conv_general_dilated(
            x, w, (s, s), [(pad, pad), (pad, pad)],
            dimension_numbers=('NCHW', 'OIHW', 'NCHW'))
        return y + b.reshape(1, -1, 1, 1)

    def bn(x, g, be, m, v):
        return (g.reshape(1, -1, 1, 1) * (x - m.reshape(1, -1, 1, 1))
                / jnp.sqrt(v.reshape(1, -1, 1, 1) + BN_EPS)
                + be.reshape(1, -1, 1, 1))

    y = jnp.maximum(bn(conv(x, p['w1'], p['b1'], stride, 1),
                       p['g1'], p['be1'], p['m1'], p['v1']), 0.0)
    y = bn(conv(y, p['w2'], p['b2'], 1, 1), p['g2'], p['be2'], p['m2'], p['v2'])
    if p.get('wres') is not None:
        r = conv(x, p['wres'], p['bres'], stride, 0)
    else:
        r = x
    return jnp.maximum(y + r, 0.0)


# ----------------------------------------------------------------------------
# Deterministic parameter construction (PyTorch layouts: OIHW weights)
# ----------------------------------------------------------------------------
def make_params(key, cin, cout):
    ks = jax.random.split(key, 8)
    p = {
        'w1': 0.1 * jax.random.normal(ks[0], (cout, cin, 3, 3), jnp.float32),
        'b1': 0.05 * jax.random.normal(ks[1], (cout,), jnp.float32),
        'g1': 1.0 + 0.1 * jax.random.normal(ks[2], (cout,), jnp.float32),
        'be1': 0.1 * jax.random.normal(ks[3], (cout,), jnp.float32),
        'm1': 0.05 * jax.random.normal(ks[4], (cout,), jnp.float32),
        'v1': 1.0 + 0.1 * jax.random.uniform(ks[5], (cout,), jnp.float32),
        'w2': 0.1 * jax.random.normal(ks[6], (cout, cout, 3, 3), jnp.float32),
        'b2': 0.05 * jax.random.normal(ks[7], (cout,), jnp.float32),
    }
    k2 = jax.random.split(ks[7], 8)
    p.update({
        'g2': 1.0 + 0.1 * jax.random.normal(k2[0], (cout,), jnp.float32),
        'be2': 0.1 * jax.random.normal(k2[1], (cout,), jnp.float32),
        'm2': 0.05 * jax.random.normal(k2[2], (cout,), jnp.float32),
        'v2': 1.0 + 0.1 * jax.random.uniform(k2[3], (cout,), jnp.float32),
    })
    if cout != cin:  # matches the PyTorch module's condition exactly
        p['wres'] = 0.1 * jax.random.normal(k2[4], (cout, cin, 1, 1), jnp.float32)
        p['bres'] = 0.05 * jax.random.normal(k2[5], (cout,), jnp.float32)
    else:
        p['wres'] = None
        p['bres'] = None
    return p


if __name__ == "__main__":
    key = jax.random.PRNGKey(0)

    def check(case, x, params, stride, compute_dtype, tol, tile_rows=None):
        out = jax.block_until_ready(
            resnet18_conv_block(x, params, stride=stride,
                                compute_dtype=compute_dtype,
                                tile_rows=tile_rows))
        ref = jax.block_until_ready(ref_block(x, params, stride))
        np.testing.assert_allclose(np.asarray(out), np.asarray(ref),
                                   rtol=tol, atol=tol, err_msg=f"case {case}")
        return out

    # Case 1: channel expansion + stride 2  (1x1 projection residual, packed path)
    kx, kp = jax.random.split(key)
    x1 = jax.random.normal(kx, (2, 4, 16, 16), jnp.float32)      # NCHW
    p1 = make_params(kp, cin=4, cout=8)
    o1 = check("1-f32", x1, p1, stride=2, compute_dtype=jnp.float32, tol=1e-3)
    assert o1.shape == (2, 8, 8, 8)
    check("1-bf16", x1, p1, stride=2, compute_dtype=jnp.bfloat16, tol=5e-2)

    # Case 2: identity residual (cin == cout, stride 1); tile_rows=8 exercises a
    # multi-tile H grid.
    kx2, kp2 = jax.random.split(kp)
    x2 = jax.random.normal(kx2, (2, 4, 16, 16), jnp.float32)
    p2 = make_params(kp2, cin=4, cout=4)
    o2 = check("2-f32", x2, p2, stride=1, compute_dtype=jnp.float32, tol=1e-3,
               tile_rows=8)
    assert o2.shape == (2, 4, 16, 16)
    check("2-bf16", x2, p2, stride=1, compute_dtype=jnp.bfloat16, tol=5e-2)

    # Case 3: projection residual with stride 1 (cin != cout)
    kx3, kp3 = jax.random.split(kp2)
    x3 = jax.random.normal(kx3, (2, 4, 16, 16), jnp.float32)
    p3 = make_params(kp3, cin=4, cout=8)
    check("3-f32", x3, p3, stride=1, compute_dtype=jnp.float32, tol=1e-3)

    print("KERNEL_OK")
</pallas_src>

<mosaic_0001>
module attributes {stable_mosaic.version = 11 : i64} {
  func.func @_conv1_kernel(%arg0: i32, %arg1: i32, %arg2: memref<1x9x2x9x8xf32, #tpu.memory_space<vmem>>, %arg3: memref<3x3x4x8xf32, #tpu.memory_space<vmem>>, %arg4: memref<1x8xf32, #tpu.memory_space<vmem>>, %arg5: memref<1x8x8x8xf32, #tpu.memory_space<vmem>>) attributes {dimension_semantics = [#tpu.dimension_semantics<parallel>, #tpu.dimension_semantics<arbitrary>], iteration_bounds = array<i64: 2, 1>, scalar_prefetch = 0 : i64, scratch_operands = 0 : i64, tpu.core_type = #tpu.core_type<tc>, window_params = [{transform_indices = @transform_0, window_bounds = array<i64: 1, 9, 2, 9, 8>}, {pipeline_mode = #tpu.pipeline_mode<synchronous>, transform_indices = @transform_1, window_bounds = array<i64: 3, 3, 4, 8>}, {pipeline_mode = #tpu.pipeline_mode<synchronous>, transform_indices = @transform_2, window_bounds = array<i64: 1, 8>}, {transform_indices = @transform_3, window_bounds = array<i64: 1, 8, 8, 8>}]} {
    %c8_i32 = arith.constant 8 : i32
    %0 = arith.muli %arg1, %c8_i32 : i32
    %cst = arith.constant 0.000000e+00 : f32
    %1 = vector.broadcast %cst : f32 to vector<64x8xf32>
    %c0_i32 = arith.constant 0 : i32
    %2 = arith.addi %0, %c0_i32 : i32
    %c0 = arith.constant 0 : index
    %3 = arith.index_cast %2 : i32 to index
    %c0_0 = arith.constant 0 : index
    %c0_1 = arith.constant 0 : index
    %c0_2 = arith.constant 0 : index
    %4 = vector.load %arg2[%c0, %3, %c0_0, %c0_1, %c0_2] : memref<1x9x2x9x8xf32, #tpu.memory_space<vmem>>, vector<1x8x1x9x8xf32>
    %5 = vector.shape_cast %4 : vector<1x8x1x9x8xf32> to vector<8x1x9x8xf32>
    %6 = vector.shape_cast %5 : vector<8x1x9x8xf32> to vector<8x9x8xf32>
    %7 = vector.extract_strided_slice %6 {offsets = [0, 0, 0], sizes = [8, 8, 8], strides = [1, 1, 1]} : vector<8x9x8xf32> to vector<8x8x8xf32>
    %8 = vector.shape_cast %7 : vector<8x8x8xf32> to vector<64x8xf32>
    %c0_3 = arith.constant 0 : index
    %c0_4 = arith.constant 0 : index
    %c0_5 = arith.constant 0 : index
    %c0_6 = arith.constant 0 : index
    %9 = vector.load %arg3[%c0_3, %c0_4, %c0_5, %c0_6] : memref<3x3x4x8xf32, #tpu.memory_space<vmem>>, vector<1x2x4x8xf32>
    %10 = vector.shape_cast %9 : vector<1x2x4x8xf32> to vector<2x4x8xf32>
    %11 = vector.shape_cast %10 : vector<2x4x8xf32> to vector<8x8xf32>
    %cst_7 = arith.constant dense<0.000000e+00> : vector<64x8xf32>
    %12 = tpu.matmul %8, %11, %cst_7 {dimension_numbers = #tpu.dot_dimension_numbers<[1], [0], [0], [1], [0, 0, 1, 1], [], []>} : vector<64x8xf32>, vector<8x8xf32>, vector<64x8xf32> -> vector<64x8xf32>
    %13 = arith.addf %1, %12 : vector<64x8xf32>
    %14 = vector.extract_strided_slice %6 {offsets = [0, 1, 0], sizes = [8, 8, 4], strides = [1, 1, 1]} : vector<8x9x8xf32> to vector<8x8x4xf32>
    %15 = vector.shape_cast %14 : vector<8x8x4xf32> to vector<64x4xf32>
    %c0_8 = arith.constant 0 : index
    %c2 = arith.constant 2 : index
    %c0_9 = arith.constant 0 : index
    %c0_10 = arith.constant 0 : index
    %16 = vector.load %arg3[%c0_8, %c2, %c0_9, %c0_10] : memref<3x3x4x8xf32, #tpu.memory_space<vmem>>, vector<1x1x4x8xf32>
    %17 = vector.shape_cast %16 : vector<1x1x4x8xf32> to vector<4x8xf32>
    %cst_11 = arith.constant dense<0.000000e+00> : vector<64x8xf32>
    %18 = tpu.matmul %15, %17, %cst_11 {dimension_numbers = #tpu.dot_dimension_numbers<[1], [0], [0], [1], [0, 0, 1, 1], [], []>} : vector<64x4xf32>, vector<4x8xf32>, vector<64x8xf32> -> vector<64x8xf32>
    %19 = arith.addf %13, %18 : vector<64x8xf32>
    %c0_i32_12 = arith.constant 0 : i32
    %20 = arith.addi %0, %c0_i32_12 : i32
    %c0_13 = arith.constant 0 : index
    %21 = arith.index_cast %20 : i32 to index
    %c1 = arith.constant 1 : index
    %c0_14 = arith.constant 0 : index
    %c0_15 = arith.constant 0 : index
    %22 = vector.load %arg2[%c0_13, %21, %c1, %c0_14, %c0_15] : memref<1x9x2x9x8xf32, #tpu.memory_space<vmem>>, vector<1x8x1x9x8xf32>
    %23 = vector.shape_cast %22 : vector<1x8x1x9x8xf32> to vector<8x1x9x8xf32>
    %24 = vector.shape_cast %23 : vector<8x1x9x8xf32> to vector<8x9x8xf32>
    %25 = vector.extract_strided_slice %24 {offsets = [0, 0, 0], sizes = [8, 8, 8], strides = [1, 1, 1]} : vector<8x9x8xf32> to vector<8x8x8xf32>
    %26 = vector.shape_cast %25 : vector<8x8x8xf32> to vector<64x8xf32>
    %c1_16 = arith.constant 1 : index
    %c0_17 = arith.constant 0 : index
    %c0_18 = arith.constant 0 : index
    %c0_19 = arith.constant 0 : index
    %27 = vector.load %arg3[%c1_16, %c0_17, %c0_18, %c0_19] : memref<3x3x4x8xf32, #tpu.memory_space<vmem>>, vector<1x2x4x8xf32>
    %28 = vector.shape_cast %27 : vector<1x2x4x8xf32> to vector<2x4x8xf32>
    %29 = vector.shape_cast %28 : vector<2x4x8xf32> to vector<8x8xf32>
    %cst_20 = arith.constant dense<0.000000e+00> : vector<64x8xf32>
    %30 = tpu.matmul %26, %29, %cst_20 {dimension_numbers = #tpu.dot_dimension_numbers<[1], [0], [0], [1], [0, 0, 1, 1], [], []>} : vector<64x8xf32>, vector<8x8xf32>, vector<64x8xf32> -> vector<64x8xf32>
    %31 = arith.addf %19, %30 : vector<64x8xf32>
    %32 = vector.extract_strided_slice %24 {offsets = [0, 1, 0], sizes = [8, 8, 4], strides = [1, 1, 1]} : vector<8x9x8xf32> to vector<8x8x4xf32>
    %33 = vector.shape_cast %32 : vector<8x8x4xf32> to vector<64x4xf32>
    %c1_21 = arith.constant 1 : index
    %c2_22 = arith.constant 2 : index
    %c0_23 = arith.constant 0 : index
    %c0_24 = arith.constant 0 : index
    %34 = vector.load %arg3[%c1_21, %c2_22, %c0_23, %c0_24] : memref<3x3x4x8xf32, #tpu.memory_space<vmem>>, vector<1x1x4x8xf32>
    %35 = vector.shape_cast %34 : vector<1x1x4x8xf32> to vector<4x8xf32>
    %cst_25 = arith.constant dense<0.000000e+00> : vector<64x8xf32>
    %36 = tpu.matmul %33, %35, %cst_25 {dimension_numbers = #tpu.dot_dimension_numbers<[1], [0], [0], [1], [0, 0, 1, 1], [], []>} : vector<64x4xf32>, vector<4x8xf32>, vector<64x8xf32> -> vector<64x8xf32>
    %37 = arith.addf %31, %36 : vector<64x8xf32>
    %c1_i32 = arith.constant 1 : i32
    %38 = arith.addi %0, %c1_i32 : i32
    %c0_26 = arith.constant 0 : index
    %39 = arith.index_cast %38 : i32 to index
    %c0_27 = arith.constant 0 : index
    %c0_28 = arith.constant 0 : index
    %c0_29 = arith.constant 0 : index
    %40 = vector.load %arg2[%c0_26, %39, %c0_27, %c0_28, %c0_29] : memref<1x9x2x9x8xf32, #tpu.memory_space<vmem>>, vector<1x8x1x9x8xf32>
    %41 = vector.shape_cast %40 : vector<1x8x1x9x8xf32> to vector<8x1x9x8xf32>
    %42 = vector.shape_cast %41 : vector<8x1x9x8xf32> to vector<8x9x8xf32>
    %43 = vector.extract_strided_slice %42 {offsets = [0, 0, 0], sizes = [8, 8, 8], strides = [1, 1, 1]} : vector<8x9x8xf32> to vector<8x8x8xf32>
    %44 = vector.shape_cast %43 : vector<8x8x8xf32> to vector<64x8xf32>
    %c2_30 = arith.constant 2 : index
    %c0_31 = arith.constant 0 : index
    %c0_32 = arith.constant 0 : index
    %c0_33 = arith.constant 0 : index
    %45 = vector.load %arg3[%c2_30, %c0_31, %c0_32, %c0_33] : memref<3x3x4x8xf32, #tpu.memory_space<vmem>>, vector<1x2x4x8xf32>
    %46 = vector.shape_cast %45 : vector<1x2x4x8xf32> to vector<2x4x8xf32>
    %47 = vector.shape_cast %46 : vector<2x4x8xf32> to vector<8x8xf32>
    %cst_34 = arith.constant dense<0.000000e+00> : vector<64x8xf32>
    %48 = tpu.matmul %44, %47, %cst_34 {dimension_numbers = #tpu.dot_dimension_numbers<[1], [0], [0], [1], [0, 0, 1, 1], [], []>} : vector<64x8xf32>, vector<8x8xf32>, vector<64x8xf32> -> vector<64x8xf32>
    %49 = arith.addf %37, %48 : vector<64x8xf32>
    %50 = vector.extract_strided_slice %42 {offsets = [0, 1, 0], sizes = [8, 8, 4], strides = [1, 1, 1]} : vector<8x9x8xf32> to vector<8x8x4xf32>
    %51 = vector.shape_cast %50 : vector<8x8x4xf32> to vector<64x4xf32>
    %c2_35 = arith.constant 2 : index
    %c2_36 = arith.constant 2 : index
    %c0_37 = arith.constant 0 : index
    %c0_38 = arith.constant 0 : index
    %52 = vector.load %arg3[%c2_35, %c2_36, %c0_37, %c0_38] : memref<3x3x4x8xf32, #tpu.memory_space<vmem>>, vector<1x1x4x8xf32>
    %53 = vector.shape_cast %52 : vector<1x1x4x8xf32> to vector<4x8xf32>
    %cst_39 = arith.constant dense<0.000000e+00> : vector<64x8xf32>
    %54 = tpu.matmul %51, %53, %cst_39 {dimension_numbers = #tpu.dot_dimension_numbers<[1], [0], [0], [1], [0, 0, 1, 1], [], []>} : vector<64x4xf32>, vector<4x8xf32>, vector<64x8xf32> -> vector<64x8xf32>
    %55 = arith.addf %49, %54 : vector<64x8xf32>
    %c0_40 = arith.constant 0 : index
    %c0_41 = arith.constant 0 : index
    %56 = vector.load %arg4[%c0_40, %c0_41] : memref<1x8xf32, #tpu.memory_space<vmem>>, vector<1x8xf32>
    %57 = vector.broadcast %56 : vector<1x8xf32> to vector<64x8xf32>
    %58 = arith.addf %55, %57 : vector<64x8xf32>
    %cst_42 = arith.constant 0.000000e+00 : f32
    %59 = vector.broadcast %cst_42 : f32 to vector<64x8xf32>
    %60 = arith.maximumf %58, %59 : vector<64x8xf32>
    %61 = vector.shape_cast %60 : vector<64x8xf32> to vector<1x8x8x8xf32>
    %c0_43 = arith.constant 0 : index
    %c0_44 = arith.constant 0 : index
    %c0_45 = arith.constant 0 : index
    %c0_46 = arith.constant 0 : index
    %62 = vector.load %arg5[%c0_43, %c0_44, %c0_45, %c0_46] : memref<1x8x8x8xf32, #tpu.memory_space<vmem>>, vector<1x8x8x8xf32>
    tpu.vector_store %arg5[%c0_43, %c0_44, %c0_45, %c0_46], %61 {strides = array<i32>} : memref<1x8x8x8xf32, #tpu.memory_space<vmem>>, vector<1x8x8x8xf32>,
    return
  }
  func.func @transform_0(%arg0: i32, %arg1: i32) -> (i32, i32, i32, i32, i32) {
    %c0_i32 = arith.constant 0 : i32
    %c0_i32_0 = arith.constant 0 : i32
    %c0_i32_1 = arith.constant 0 : i32
    %c0_i32_2 = arith.constant 0 : i32
    %c0_i32_3 = arith.constant 0 : i32
    return %arg0, %c0_i32, %c0_i32_0, %c0_i32_1, %c0_i32_2 : i32, i32, i32, i32, i32
  }
  func.func @transform_1(%arg0: i32, %arg1: i32) -> (i32, i32, i32, i32) {
    %c0_i32 = arith.constant 0 : i32
    %c0_i32_0 = arith.constant 0 : i32
    %c0_i32_1 = arith.constant 0 : i32
    %c0_i32_2 = arith.constant 0 : i32
    %c0_i32_3 = arith.constant 0 : i32
    return %c0_i32, %c0_i32_0, %c0_i32_1, %c0_i32_2 : i32, i32, i32, i32
  }
  func.func @transform_2(%arg0: i32, %arg1: i32) -> (i32, i32) {
    %c0_i32 = arith.constant 0 : i32
    %c0_i32_0 = arith.constant 0 : i32
    %c0_i32_1 = arith.constant 0 : i32
    return %c0_i32, %c0_i32_0 : i32, i32
  }
  func.func @transform_3(%arg0: i32, %arg1: i32) -> (i32, i32, i32, i32) {
    %c0_i32 = arith.constant 0 : i32
    %c0_i32_0 = arith.constant 0 : i32
    %c0_i32_1 = arith.constant 0 : i32
    return %arg0, %arg1, %c0_i32, %c0_i32_0 : i32, i32, i32, i32
  }
}

module attributes {stable_mosaic.version = 11 : i64} {
  func.func @_conv2_proj_kernel(%arg0: i32, %arg1: i32, %arg2: memref<1x10x10x8xf32, #tpu.memory_space<vmem>>, %arg3: memref<1x9x2x9x8xf32, #tpu.memory_space<vmem>>, %arg4: memref<3x3x8x8xf32, #tpu.memory_space<vmem>>, %arg5: memref<1x8xf32, #tpu.memory_space<vmem>>, %arg6: memref<8x8xf32, #tpu.memory_space<vmem>>, %arg7: memref<1x8xf32, #tpu.memory_space<vmem>>, %arg8: memref<1x8x8x8xf32, #tpu.memory_space<vmem>>) attributes {dimension_semantics = [#tpu.dimension_semantics<parallel>, #tpu.dimension_semantics<arbitrary>], iteration_bounds = array<i64: 2, 1>, scalar_prefetch = 0 : i64, scratch_operands = 0 : i64, tpu.core_type = #tpu.core_type<tc>, window_params = [{transform_indices = @transform_0, window_bounds = array<i64: 1, 10, 10, 8>}, {transform_indices = @transform_1, window_bounds = array<i64: 1, 9, 2, 9, 8>}, {pipeline_mode = #tpu.pipeline_mode<synchronous>, transform_indices = @transform_2, window_bounds = array<i64: 3, 3, 8, 8>}, {pipeline_mode = #tpu.pipeline_mode<synchronous>, transform_indices = @transform_3, window_bounds = array<i64: 1, 8>}, {pipeline_mode = #tpu.pipeline_mode<synchronous>, transform_indices = @transform_4, window_bounds = array<i64: 8, 8>}, {pipeline_mode = #tpu.pipeline_mode<synchronous>, transform_indices = @transform_5, window_bounds = array<i64: 1, 8>}, {transform_indices = @transform_6, window_bounds = array<i64: 1, 8, 8, 8>}]} {
    %c8_i32 = arith.constant 8 : i32
    %0 = arith.muli %arg1, %c8_i32 : i32
    %cst = arith.constant 0.000000e+00 : f32
    %1 = vector.broadcast %cst : f32 to vector<64x8xf32>
    %c0_i32 = arith.constant 0 : i32
    %2 = arith.addi %0, %c0_i32 : i32
    %c0 = arith.constant 0 : index
    %3 = arith.index_cast %2 : i32 to index
    %c0_0 = arith.constant 0 : index
    %c0_1 = arith.constant 0 : index
    %4 = vector.load %arg2[%c0, %3, %c0_0, %c0_1] : memref<1x10x10x8xf32, #tpu.memory_space<vmem>>, vector<1x8x10x8xf32>
    %5 = vector.shape_cast %4 : vector<1x8x10x8xf32> to vector<8x10x8xf32>
    %6 = vector.extract_strided_slice %5 {offsets = [0, 0, 0], sizes = [8, 8, 8], strides = [1, 1, 1]} : vector<8x10x8xf32> to vector<8x8x8xf32>
    %7 = vector.shape_cast %6 : vector<8x8x8xf32> to vector<64x8xf32>
    %c0_2 = arith.constant 0 : index
    %c0_3 = arith.constant 0 : index
    %c0_4 = arith.constant 0 : index
    %c0_5 = arith.constant 0 : index
    %8 = vector.load %arg4[%c0_2, %c0_3, %c0_4, %c0_5] : memref<3x3x8x8xf32, #tpu.memory_space<vmem>>, vector<1x1x8x8xf32>
    %9 = vector.shape_cast %8 : vector<1x1x8x8xf32> to vector<8x8xf32>
    %cst_6 = arith.constant dense<0.000000e+00> : vector<64x8xf32>
    %10 = tpu.matmul %7, %9, %cst_6 {dimension_numbers = #tpu.dot_dimension_numbers<[1], [0], [0], [1], [0, 0, 1, 1], [], []>} : vector<64x8xf32>, vector<8x8xf32>, vector<64x8xf32> -> vector<64x8xf32>
    %11 = arith.addf %1, %10 : vector<64x8xf32>
    %12 = vector.extract_strided_slice %5 {offsets = [0, 1, 0], sizes = [8, 8, 8], strides = [1, 1, 1]} : vector<8x10x8xf32> to vector<8x8x8xf32>
    %13 = vector.shape_cast %12 : vector<8x8x8xf32> to vector<64x8xf32>
    %c0_7 = arith.constant 0 : index
    %c1 = arith.constant 1 : index
    %c0_8 = arith.constant 0 : index
    %c0_9 = arith.constant 0 : index
    %14 = vector.load %arg4[%c0_7, %c1, %c0_8, %c0_9] : memref<3x3x8x8xf32, #tpu.memory_space<vmem>>, vector<1x1x8x8xf32>
    %15 = vector.shape_cast %14 : vector<1x1x8x8xf32> to vector<8x8xf32>
    %cst_10 = arith.constant dense<0.000000e+00> : vector<64x8xf32>
    %16 = tpu.matmul %13, %15, %cst_10 {dimension_numbers = #tpu.dot_dimension_numbers<[1], [0], [0], [1], [0, 0, 1, 1], [], []>} : vector<64x8xf32>, vector<8x8xf32>, vector<64x8xf32> -> vector<64x8xf32>
    %17 = arith.addf %11, %16 : vector<64x8xf32>
    %18 = vector.extract_strided_slice %5 {offsets = [0, 2, 0], sizes = [8, 8, 8], strides = [1, 1, 1]} : vector<8x10x8xf32> to vector<8x8x8xf32>
    %19 = vector.shape_cast %18 : vector<8x8x8xf32> to vector<64x8xf32>
    %c0_11 = arith.constant 0 : index
    %c2 = arith.constant 2 : index
    %c0_12 = arith.constant 0 : index
    %c0_13 = arith.constant 0 : index
    %20 = vector.load %arg4[%c0_11, %c2, %c0_12, %c0_13] : memref<3x3x8x8xf32, #tpu.memory_space<vmem>>, vector<1x1x8x8xf32>
    %21 = vector.shape_cast %20 : vector<1x1x8x8xf32> to vector<8x8xf32>
    %cst_14 = arith.constant dense<0.000000e+00> : vector<64x8xf32>
    %22 = tpu.matmul %19, %21, %cst_14 {dimension_numbers = #tpu.dot_dimension_numbers<[1], [0], [0], [1], [0, 0, 1, 1], [], []>} : vector<64x8xf32>, vector<8x8xf32>, vector<64x8xf32> -> vector<64x8xf32>
    %23 = arith.addf %17, %22 : vector<64x8xf32>
    %c1_i32 = arith.constant 1 : i32
    %24 = arith.addi %0, %c1_i32 : i32
    %c0_15 = arith.constant 0 : index
    %25 = arith.index_cast %24 : i32 to index
    %c0_16 = arith.constant 0 : index
    %c0_17 = arith.constant 0 : index
    %26 = vector.load %arg2[%c0_15, %25, %c0_16, %c0_17] : memref<1x10x10x8xf32, #tpu.memory_space<vmem>>, vector<1x8x10x8xf32>
    %27 = vector.shape_cast %26 : vector<1x8x10x8xf32> to vector<8x10x8xf32>
    %28 = vector.extract_strided_slice %27 {offsets = [0, 0, 0], sizes = [8, 8, 8], strides = [1, 1, 1]} : vector<8x10x8xf32> to vector<8x8x8xf32>
    %29 = vector.shape_cast %28 : vector<8x8x8xf32> to vector<64x8xf32>
    %c1_18 = arith.constant 1 : index
    %c0_19 = arith.constant 0 : index
    %c0_20 = arith.constant 0 : index
    %c0_21 = arith.constant 0 : index
    %30 = vector.load %arg4[%c1_18, %c0_19, %c0_20, %c0_21] : memref<3x3x8x8xf32, #tpu.memory_space<vmem>>, vector<1x1x8x8xf32>
    %31 = vector.shape_cast %30 : vector<1x1x8x8xf32> to vector<8x8xf32>
    %cst_22 = arith.constant dense<0.000000e+00> : vector<64x8xf32>
    %32 = tpu.matmul %29, %31, %cst_22 {dimension_numbers = #tpu.dot_dimension_numbers<[1], [0], [0], [1], [0, 0, 1, 1], [], []>} : vector<64x8xf32>, vector<8x8xf32>, vector<64x8xf32> -> vector<64x8xf32>
    %33 = arith.addf %23, %32 : vector<64x8xf32>
    %34 = vector.extract_strided_slice %27 {offsets = [0, 1, 0], sizes = [8, 8, 8], strides = [1, 1, 1]} : vector<8x10x8xf32> to vector<8x8x8xf32>
    %35 = vector.shape_cast %34 : vector<8x8x8xf32> to vector<64x8xf32>
    %c1_23 = arith.constant 1 : index
    %c1_24 = arith.constant 1 : index
    %c0_25 = arith.constant 0 : index
    %c0_26 = arith.constant 0 : index
    %36 = vector.load %arg4[%c1_23, %c1_24, %c0_25, %c0_26] : memref<3x3x8x8xf32, #tpu.memory_space<vmem>>, vector<1x1x8x8xf32>
    %37 = vector.shape_cast %36 : vector<1x1x8x8xf32> to vector<8x8xf32>
    %cst_27 = arith.constant dense<0.000000e+00> : vector<64x8xf32>
    %38 = tpu.matmul %35, %37, %cst_27 {dimension_numbers = #tpu.dot_dimension_numbers<[1], [0], [0], [1], [0, 0, 1, 1], [], []>} : vector<64x8xf32>, vector<8x8xf32>, vector<64x8xf32> -> vector<64x8xf32>
    %39 = arith.addf %33, %38 : vector<64x8xf32>
    %40 = vector.extract_strided_slice %27 {offsets = [0, 2, 0], sizes = [8, 8, 8], strides = [1, 1, 1]} : vector<8x10x8xf32> to vector<8x8x8xf32>
    %41 = vector.shape_cast %40 : vector<8x8x8xf32> to vector<64x8xf32>
    %c1_28 = arith.constant 1 : index
    %c2_29 = arith.constant 2 : index
    %c0_30 = arith.constant 0 : index
    %c0_31 = arith.constant 0 : index
    %42 = vector.load %arg4[%c1_28, %c2_29, %c0_30, %c0_31] : memref<3x3x8x8xf32, #tpu.memory_space<vmem>>, vector<1x1x8x8xf32>
    %43 = vector.shape_cast %42 : vector<1x1x8x8xf32> to vector<8x8xf32>
    %cst_32 = arith.constant dense<0.000000e+00> : vector<64x8xf32>
    %44 = tpu.matmul %41, %43, %cst_32 {dimension_numbers = #tpu.dot_dimension_numbers<[1], [0], [0], [1], [0, 0, 1, 1], [], []>} : vector<64x8xf32>, vector<8x8xf32>, vector<64x8xf32> -> vector<64x8xf32>
    %45 = arith.addf %39, %44 : vector<64x8xf32>
    %c2_i32 = arith.constant 2 : i32
    %46 = arith.addi %0, %c2_i32 : i32
    %c0_33 = arith.constant 0 : index
    %47 = arith.index_cast %46 : i32 to index
    %c0_34 = arith.constant 0 : index
    %c0_35 = arith.constant 0 : index
    %48 = vector.load %arg2[%c0_33, %47, %c0_34, %c0_35] : memref<1x10x10x8xf32, #tpu.memory_space<vmem>>, vector<1x8x10x8xf32>
    %49 = vector.shape_cast %48 : vector<1x8x10x8xf32> to vector<8x10x8xf32>
    %50 = vector.extract_strided_slice %49 {offsets = [0, 0, 0], sizes = [8, 8, 8], strides = [1, 1, 1]} : vector<8x10x8xf32> to vector<8x8x8xf32>
    %51 = vector.shape_cast %50 : vector<8x8x8xf32> to vector<64x8xf32>
    %c2_36 = arith.constant 2 : index
    %c0_37 = arith.constant 0 : index
    %c0_38 = arith.constant 0 : index
    %c0_39 = arith.constant 0 : index
    %52 = vector.load %arg4[%c2_36, %c0_37, %c0_38, %c0_39] : memref<3x3x8x8xf32, #tpu.memory_space<vmem>>, vector<1x1x8x8xf32>
    %53 = vector.shape_cast %52 : vector<1x1x8x8xf32> to vector<8x8xf32>
    %cst_40 = arith.constant dense<0.000000e+00> : vector<64x8xf32>
    %54 = tpu.matmul %51, %53, %cst_40 {dimension_numbers = #tpu.dot_dimension_numbers<[1], [0], [0], [1], [0, 0, 1, 1], [], []>} : vector<64x8xf32>, vector<8x8xf32>, vector<64x8xf32> -> vector<64x8xf32>
    %55 = arith.addf %45, %54 : vector<64x8xf32>
    %56 = vector.extract_strided_slice %49 {offsets = [0, 1, 0], sizes = [8, 8, 8], strides = [1, 1, 1]} : vector<8x10x8xf32> to vector<8x8x8xf32>
    %57 = vector.shape_cast %56 : vector<8x8x8xf32> to vector<64x8xf32>
    %c2_41 = arith.constant 2 : index
    %c1_42 = arith.constant 1 : index
    %c0_43 = arith.constant 0 : index
    %c0_44 = arith.constant 0 : index
    %58 = vector.load %arg4[%c2_41, %c1_42, %c0_43, %c0_44] : memref<3x3x8x8xf32, #tpu.memory_space<vmem>>, vector<1x1x8x8xf32>
    %59 = vector.shape_cast %58 : vector<1x1x8x8xf32> to vector<8x8xf32>
    %cst_45 = arith.constant dense<0.000000e+00> : vector<64x8xf32>
    %60 = tpu.matmul %57, %59, %cst_45 {dimension_numbers = #tpu.dot_dimension_numbers<[1], [0], [0], [1], [0, 0, 1, 1], [], []>} : vector<64x8xf32>, vector<8x8xf32>, vector<64x8xf32> -> vector<64x8xf32>
    %61 = arith.addf %55, %60 : vector<64x8xf32>
    %62 = vector.extract_strided_slice %49 {offsets = [0, 2, 0], sizes = [8, 8, 8], strides = [1, 1, 1]} : vector<8x10x8xf32> to vector<8x8x8xf32>
    %63 = vector.shape_cast %62 : vector<8x8x8xf32> to vector<64x8xf32>
    %c2_46 = arith.constant 2 : index
    %c2_47 = arith.constant 2 : index
    %c0_48 = arith.constant 0 : index
    %c0_49 = arith.constant 0 : index
    %64 = vector.load %arg4[%c2_46, %c2_47, %c0_48, %c0_49] : memref<3x3x8x8xf32, #tpu.memory_space<vmem>>, vector<1x1x8x8xf32>
    %65 = vector.shape_cast %64 : vector<1x1x8x8xf32> to vector<8x8xf32>
    %cst_50 = arith.constant dense<0.000000e+00> : vector<64x8xf32>
    %66 = tpu.matmul %63, %65, %cst_50 {dimension_numbers = #tpu.dot_dimension_numbers<[1], [0], [0], [1], [0, 0, 1, 1], [], []>} : vector<64x8xf32>, vector<8x8xf32>, vector<64x8xf32> -> vector<64x8xf32>
    %67 = arith.addf %61, %66 : vector<64x8xf32>
    %c0_51 = arith.constant 0 : index
    %c0_52 = arith.constant 0 : index
    %68 = vector.load %arg5[%c0_51, %c0_52] : memref<1x8xf32, #tpu.memory_space<vmem>>, vector<1x8xf32>
    %69 = vector.broadcast %68 : vector<1x8xf32> to vector<64x8xf32>
    %70 = arith.addf %67, %69 : vector<64x8xf32>
    %c8_i32_53 = arith.constant 8 : i32
    %71 = arith.muli %arg1, %c8_i32_53 : i32
    %c0_54 = arith.constant 0 : index
    %72 = arith.index_cast %71 : i32 to index
    %c1_55 = arith.constant 1 : index
    %c0_56 = arith.constant 0 : index
    %c0_57 = arith.constant 0 : index
    %73 = vector.load %arg3[%c0_54, %72, %c1_55, %c0_56, %c0_57] : memref<1x9x2x9x8xf32, #tpu.memory_space<vmem>>, vector<1x8x1x8x8xf32>
    %74 = vector.shape_cast %73 : vector<1x8x1x8x8xf32> to vector<8x1x8x8xf32>
    %75 = vector.shape_cast %74 : vector<8x1x8x8xf32> to vector<64x8xf32>
    %c0_58 = arith.constant 0 : index
    %c0_59 = arith.constant 0 : index
    %76 = vector.load %arg6[%c0_58, %c0_59] : memref<8x8xf32, #tpu.memory_space<vmem>>, vector<8x8xf32>
    %cst_60 = arith.constant dense<0.000000e+00> : vector<64x8xf32>
    %77 = tpu.matmul %75, %76, %cst_60 {dimension_numbers = #tpu.dot_dimension_numbers<[1], [0], [0], [1], [0, 0, 1, 1], [], []>} : vector<64x8xf32>, vector<8x8xf32>, vector<64x8xf32> -> vector<64x8xf32>
    %c0_61 = arith.constant 0 : index
    %c0_62 = arith.constant 0 : index
    %78 = vector.load %arg7[%c0_61, %c0_62] : memref<1x8xf32, #tpu.memory_space<vmem>>, vector<1x8xf32>
    %79 = vector.broadcast %78 : vector<1x8xf32> to vector<64x8xf32>
    %80 = arith.addf %77, %79 : vector<64x8xf32>
    %81 = arith.addf %70, %80 : vector<64x8xf32>
    %cst_63 = arith.constant 0.000000e+00 : f32
    %82 = vector.broadcast %cst_63 : f32 to vector<64x8xf32>
    %83 = arith.maximumf %81, %82 : vector<64x8xf32>
    %84 = vector.shape_cast %83 : vector<64x8xf32> to vector<1x8x8x8xf32>
    %c0_64 = arith.constant 0 : index
    %c0_65 = arith.constant 0 : index
    %c0_66 = arith.constant 0 : index
    %c0_67 = arith.constant 0 : index
    %85 = vector.load %arg8[%c0_64, %c0_65, %c0_66, %c0_67] : memref<1x8x8x8xf32, #tpu.memory_space<vmem>>, vector<1x8x8x8xf32>
    tpu.vector_store %arg8[%c0_64, %c0_65, %c0_66, %c0_67], %84 {strides = array<i32>} : memref<1x8x8x8xf32, #tpu.memory_space<vmem>>, vector<1x8x8x8xf32>,
    return
  }
  func.func @transform_0(%arg0: i32, %arg1: i32) -> (i32, i32, i32, i32) {
    %c0_i32 = arith.constant 0 : i32
    %c0_i32_0 = arith.constant 0 : i32
    %c0_i32_1 = arith.constant 0 : i32
    %c0_i32_2 = arith.constant 0 : i32
    return %arg0, %c0_i32, %c0_i32_0, %c0_i32_1 : i32, i32, i32, i32
  }
  func.func @transform_1(%arg0: i32, %arg1: i32) -> (i32, i32, i32, i32, i32) {
    %c0_i32 = arith.constant 0 : i32
    %c0_i32_0 = arith.constant 0 : i32
    %c0_i32_1 = arith.constant 0 : i32
    %c0_i32_2 = arith.constant 0 : i32
    %c0_i32_3 = arith.constant 0 : i32
    return %arg0, %c0_i32, %c0_i32_0, %c0_i32_1, %c0_i32_2 : i32, i32, i32, i32, i32
  }
  func.func @transform_2(%arg0: i32, %arg1: i32) -> (i32, i32, i32, i32) {
    %c0_i32 = arith.constant 0 : i32
    %c0_i32_0 = arith.constant 0 : i32
    %c0_i32_1 = arith.constant 0 : i32
    %c0_i32_2 = arith.constant 0 : i32
    %c0_i32_3 = arith.constant 0 : i32
    return %c0_i32, %c0_i32_0, %c0_i32_1, %c0_i32_2 : i32, i32, i32, i32
  }
  func.func @transform_3(%arg0: i32, %arg1: i32) -> (i32, i32) {
    %c0_i32 = arith.constant 0 : i32
    %c0_i32_0 = arith.constant 0 : i32
    %c0_i32_1 = arith.constant 0 : i32
    return %c0_i32, %c0_i32_0 : i32, i32
  }
  func.func @transform_4(%arg0: i32, %arg1: i32) -> (i32, i32) {
    %c0_i32 = arith.constant 0 : i32
    %c0_i32_0 = arith.constant 0 : i32
    %c0_i32_1 = arith.constant 0 : i32
    return %c0_i32, %c0_i32_0 : i32, i32
  }
  func.func @transform_5(%arg0: i32, %arg1: i32) -> (i32, i32) {
    %c0_i32 = arith.constant 0 : i32
    %c0_i32_0 = arith.constant 0 : i32
    %c0_i32_1 = arith.constant 0 : i32
    return %c0_i32, %c0_i32_0 : i32, i32
  }
  func.func @transform_6(%arg0: i32, %arg1: i32) -> (i32, i32, i32, i32) {
    %c0_i32 = arith.constant 0 : i32
    %c0_i32_0 = arith.constant 0 : i32
    %c0_i32_1 = arith.constant 0 : i32
    return %arg0, %arg1, %c0_i32, %c0_i32_0 : i32, i32, i32, i32
  }
}

</mosaic_0001>

<bundles_post_ra>
// kernel: resnet18_conv_block.2
= control target key start
LH: loop header
LB: loop body
LE: loop exit
PB: predicated region body
PF: predicated region fallthrough
CT: control target
= control target key end

     0   :  { %s1640_s12 = smov 0   ;;  %s1642_s13 = smov 0   ;;  %s1944_s0 = inlined_call_operand.vmem [shape: f32[2,9,2,9,8], index: 0, kind: input, shape index: {}]   ;;  %s1945_s1 = inlined_call_operand.vmem [shape: f32[3,3,4,8], index: 1, kind: input, shape index: {}]   ;;  %s1946_s2 = inlined_call_operand.vmem [shape: f32[1,8], index: 2, kind: input, shape index: {}]   ;;  %s1947_s3 = inlined_call_operand.vmem [shape: f32[2,8,8,8], index: 3, kind: output, shape index: {}]  }
   0x1   :  { %s1644_s14 = smov 0  }
   0x2 LB: > { %s25_s15 = sadd.s32 1, %s1614_s13  ;;  %p1292_p0 = scmp.ge.s32.totalorder %s1618_s14, 1  ;;  %s1618_s14 = sphi %s1644_s14, %s13_s14   ;;  %s1614_s13 = sphi %s1642_s13, %s1949_s13   ;;  %s1610_s12 = sphi %s1640_s12, %s1948_s12  }
   0x3   : > { %p27_p1 = scmp.ge.s32.totalorder %s25_s15, 2  ;;  %p151_p2 = scmp.lt.s32.totalorder %s1618_s14, 3 }
   0x5   : > { %s1951_s15 = smov (%p27_p1, %s25_s15), 0  ;;  %p152_p3 = pnand %p1292_p0, %p151_p2 }
   0x6   : > { %v1296_v0 = vld [vmem:[%s1945_s1 + $0x8] sm:$0xf] (!%p152_p3)  ;;  %vm275_vm0 = vcmask (!%p152_p3), 1043456   ;;  %v1340_v1 = vld [vmem:[%s1945_s1 + $0x14] sm:$0xf] (!%p152_p3)  ;;  %p179_p4 = scmp.lt.s32.totalorder (!%p152_p3), %s1610_s12, 1 }
   0x7   : > { %155 = sbr.rel (%p152_p3) target bundleno = 289 (0x121), region = 32  ;;  %1444 = vmatprep.subr.msk.mxu1 (!%p152_p3), %vm275_vm0, %v1296_v0  ;;  %1486 = vmatprep.subr.msk.mxu0 (!%p152_p3), %vm275_vm0, %v1340_v1  ;;  %v1593_v2 = vld [vmem:[%s1945_s1] sm:$0xff] (!%p152_p3)   ;;  %v1594_v3 = vld [vmem:[%s1945_s1 + $0x18] sm:$0xff] (!%p152_p3)   ;;  %vm231_vm1 = vcmask (!%p152_p3), 1046528   ;;  %vm258_vm2 = vcmask (!%p152_p3), 31744   ;;  %v1710_v22 = vld [vmem:[%s1945_s1 + $0xc] sm:$0xff] (!%p152_p3)  }
   0x8   : > { %1445 = vmatpush3.msk.msra.mxu1 (!%p152_p3), %vm275_vm0, %v1296_v0  ;;  %1487 = vmatpush3.msk.msra.mxu0 (!%p152_p3), %vm275_vm0, %v1340_v1  ;;  %v1734_v35 = vld [vmem:[%s1945_s1 + $0x20] sm:$0xf] (!%p152_p3)  ;;  %vm388_vm3 = vcmask (!%p152_p3), 64512  }
   0x9   : > { %1458 = vmatprep.subr.mxu1 (!%p152_p3), %v1593_v2  ;;  %1500 = vmatprep.subr.mxu0 (!%p152_p3), %v1594_v3 }
   0xe   : > { %s1953_s12 = smov (!%p179_p4, %s1610_s12), 1 }
   0xf   : > { %s1568_s24 = smul.u32 288, %s1953_s12  ;;  %s1389_s7 = sshll.u32 %s1953_s12, 6 }
  0x10   : > { %s1917_s10 = scalar_lea.vmem %s1947_s3, %s1389_s7 }
  0x11   : > { %s1680_s27 = scalar_lea.vmem %s1944_s0, %s1568_s24 }
  0x12   : > { %v1683_v4 = vld [vmem:[%s1680_s27] sm:$0xff]  ;;  %v198_v5 = vld [vmem:[%s1680_s27 + $0x8] sm:$0x1]  ;;  %v1687_v6 = vld [vmem:[%s1680_s27 + $0x10] sm:$0xff] }
  0x13   : > { %v232_v7 = vrot.slane %v1683_v4, 1  ;;  %v233_v8 = vrot.slane %v198_v5, 1  ;;  %v1315_v9 = vld [vmem:[%s1680_s27 + $0x18] sm:$0x1]  ;;  %v680_v10 = vrot.slane %v1687_v6, 1  ;;  %v1693_v11 = vld [vmem:[%s1680_s27 + $0x20] sm:$0xff] }
  0x14   : > { %v681_v12 = vrot.slane %v1315_v9, 1  ;;  %v200_v13 = vld [vmem:[%s1680_s27 + $0x28] sm:$0x1]  ;;  %v235_v14 = vrot.slane %v1693_v11, 1  ;;  %v1698_v15 = vld [vmem:[%s1680_s27 + $0x30] sm:$0xff]  ;;  %v1701_v16 = vld [vmem:[%s1680_s27 + $0x40] sm:$0xff] }
  0x15   : > { %v234_v17 = vsel %vm231_vm1, %v232_v7, %v233_v8  ;;  %v236_v18 = vrot.slane %v200_v13, 1  ;;  %v1317_v19 = vld [vmem:[%s1680_s27 + $0x38] sm:$0x1]  ;;  %v683_v20 = vrot.slane %v1698_v15, 1  ;;  %v202_v21 = vld [vmem:[%s1680_s27 + $0x48] sm:$0x1] }
  0x16   : > { %1446 = vmatprep.mubr.msk.f32.mxu1 %vm258_vm2, %v234_v17  ;;  %v682_v23 = vsel %vm231_vm1, %v680_v10, %v681_v12  ;;  %v684_v24 = vrot.slane %v1317_v19, 1  ;;  %v238_v25 = vrot.slane %v1701_v16, 1  ;;  %v239_v26 = vrot.slane %v202_v21, 1  ;;  %v1716_v27 = vld [vmem:[%s1680_s27 + $0x50] sm:$0xff]  ;;  %v1319_v28 = vld [vmem:[%s1680_s27 + $0x58] sm:$0x1] }
  0x17   : > { %1488 = vmatprep.mubr.msk.f32.mxu0 %vm258_vm2, %v682_v23  ;;  %v237_v29 = vsel %vm231_vm1, %v235_v14, %v236_v18  ;;  %v686_v30 = vrot.slane %v1716_v27, 1  ;;  %v687_v31 = vrot.slane %v1319_v28, 1  ;;  %v1725_v32 = vld [vmem:[%s1680_s27 + $0x60] sm:$0xff]  ;;  %v204_v33 = vld [vmem:[%s1680_s27 + $0x68] sm:$0x1]  ;;  %v1729_v34 = vld [vmem:[%s1680_s27 + $0x70] sm:$0xff] }
  0x18   : > { %1447 = vmatmul.mubr.msk.f32.vlgmr.msra.gmra.mrb[0].mxu1 %vm258_vm2, %v237_v29  ;;  %v685_v36 = vsel %vm231_vm1, %v683_v20, %v684_v24  ;;  %v240_v37 = vsel %vm231_vm1, %v238_v25, %v239_v26  ;;  %v241_v38 = vrot.slane %v1725_v32, 1  ;;  %v242_v39 = vrot.slane %v204_v33, 1  ;;  %v1321_v40 = vld [vmem:[%s1680_s27 + $0x78] sm:$0x1]  ;;  %v1744_v41 = vld [vmem:[%s1680_s27 + $0x80] sm:$0xff]  ;;  %v1747_v42 = vld [vmem:[%s1680_s27 + $0x90] sm:$0xff] }
  0x19   : > { %1459 = vmatpush3.msra.mxu1 %v1593_v2  ;;  %1489 = vmatmul.mubr.msk.f32.vlgmr.msra.gmra.mrb[0].mxu0 %vm258_vm2, %v685_v36  ;;  %v688_v43 = vsel %vm231_vm1, %v686_v30, %v687_v31  ;;  %v689_v44 = vrot.slane %v1729_v34, 1  ;;  %v690_v45 = vrot.slane %v1321_v40, 1  ;;  %v206_v46 = vld [vmem:[%s1680_s27 + $0x88] sm:$0x1]  ;;  %v244_v47 = vrot.slane %v1744_v41, 1  ;;  %v1755_v48 = vld [vmem:[%s1680_s27 + $0xa0] sm:$0xff] }
  0x1a   : > { %1501 = vmatpush3.msra.mxu0 %v1594_v3  ;;  %1449 = vmatprep.mubr.msk.f32.mxu1 %vm258_vm2, %v240_v37  ;;  %v243_v49 = vsel %vm231_vm1, %v241_v38, %v242_v39  ;;  %v245_v50 = vrot.slane %v206_v46, 1  ;;  %v1323_v51 = vld [vmem:[%s1680_s27 + $0x98] sm:$0x1]  ;;  %v692_v52 = vrot.slane %v1747_v42, 1  ;;  %v208_v53 = vld [vmem:[%s1680_s27 + $0xa8] sm:$0x1] }
  0x1b   : > { %1491 = vmatprep.mubr.msk.f32.mxu0 %vm258_vm2, %v688_v43  ;;  %v691_v54 = vsel %vm231_vm1, %v689_v44, %v690_v45  ;;  %v693_v55 = vrot.slane %v1323_v51, 1  ;;  %v247_v56 = vrot.slane %v1755_v48, 1  ;;  %v248_v57 = vrot.slane %v208_v53, 1  ;;  %v1768_v58 = vld [vmem:[%s1680_s27 + $0xb0] sm:$0xff]  ;;  %v1325_v59 = vld [vmem:[%s1680_s27 + $0xb8] sm:$0x1]  ;;  %1472 = vmatprep.subr.mxu1 %v1710_v22 }
  0x1c   : > { %1450 = vmatmul.mubr.msk.f32.gmra.mrb[2].mxu1 %vm258_vm2, %v243_v49  ;;  %v246_v60 = vsel %vm231_vm1, %v244_v47, %v245_v50  ;;  %v695_v61 = vrot.slane %v1768_v58, 1  ;;  %v696_v62 = vrot.slane %v1325_v59, 1  ;;  %v1778_v63 = vld [vmem:[%s1680_s27 + $0xc0] sm:$0xff]  ;;  %v210_v0 = vld [vmem:[%s1680_s27 + $0xc8] sm:$0x1]  ;;  %v1782_v1 = vld [vmem:[%s1680_s27 + $0xd0] sm:$0xff]  ;;  %1514 = vmatprep.subr.msk.mxu0 %vm275_vm0, %v1734_v35 }
  0x1d   : > { %1492 = vmatmul.mubr.msk.f32.gmra.mrb[2].mxu0 %vm258_vm2, %v691_v54  ;;  %1452 = vmatprep.mubr.msk.f32.mxu1 %vm258_vm2, %v246_v60  ;;  %v694_v2 = vsel %vm231_vm1, %v692_v52, %v693_v55  ;;  %v249_v3 = vsel %vm231_vm1, %v247_v56, %v248_v57  ;;  %v250_v5 = vrot.slane %v1778_v63, 1  ;;  %v251_v7 = vrot.slane %v210_v0, 1  ;;  %v1327_v8 = vld [vmem:[%s1680_s27 + $0xd8] sm:$0x1]  ;;  %v1795_v9 = vld [vmem:[%s1680_s27 + $0xe0] sm:$0xff]  ;;  %v1798_v10 = vld [vmem:[%s1680_s27 + $0xf0] sm:$0xff] }
  0x1e   : > { %1494 = vmatprep.mubr.msk.f32.mxu0 %vm258_vm2, %v694_v2  ;;  %v697_v12 = vsel %vm231_vm1, %v695_v61, %v696_v62  ;;  %v698_v13 = vrot.slane %v1782_v1, 1  ;;  %v699_v17 = vrot.slane %v1327_v8, 1  ;;  %v212_v18 = vld [vmem:[%s1680_s27 + $0xe8] sm:$0x1]  ;;  %v253_v19 = vrot.slane %v1795_v9, 1 }
  0x1f   : > { %v252_v20 = vsel %vm231_vm1, %v250_v5, %v251_v7  ;;  %v254_v21 = vrot.slane %v212_v18, 1  ;;  %v1329_v23 = vld [vmem:[%s1680_s27 + $0xf8] sm:$0x1]  ;;  %v701_v24 = vrot.slane %v1798_v10, 1  ;;  %v1353_v31 = vld [vmem:[%s1680_s27 + $0x48] sm:$0x1] }
  0x20   : > { %1453 = vmatmul.mubr.msk.f32.gmra.mrb[4].mxu1 %vm258_vm2, %v249_v3  ;;  %v700_v26 = vsel %vm231_vm1, %v698_v13, %v699_v17  ;;  %v702_v28 = vrot.slane %v1329_v23, 1  ;;  %v1355_v33 = vld [vmem:[%s1680_s27 + $0x68] sm:$0x1]  ;;  %v1013_v36 = vrot.slane %v1353_v31, 1  ;;  %v1386_v50 = vld [vmem:[%s1946_s2] ss:$0 sm:$0xff] }
  0x21   : > { %1495 = vmatmul.mubr.msk.f32.gmra.mrb[4].mxu0 %vm258_vm2, %v697_v12  ;;  %1455 = vmatprep.mubr.msk.f32.mxu1 %vm258_vm2, %v252_v20  ;;  %v255_v29 = vsel %vm231_vm1, %v253_v19, %v254_v21  ;;  %v1016_v39 = vrot.slane %v1355_v33, 1  ;;  %v1357_v40 = vld [vmem:[%s1680_s27 + $0x88] sm:$0x1] }
  0x22   : > { %1497 = vmatprep.mubr.msk.f32.mxu0 %vm258_vm2, %v700_v26  ;;  %v703_v30 = vsel %vm231_vm1, %v701_v24, %v702_v28  ;;  %v1359_v43 = vld [vmem:[%s1680_s27 + $0xa8] sm:$0x1]  ;;  %v1019_v44 = vrot.slane %v1357_v40, 1 }
  0x23   : > { %v1022_v45 = vrot.slane %v1359_v43, 1  ;;  %v1361_v46 = vld [vmem:[%s1680_s27 + $0xc8] sm:$0x1] }
  0x24   : > { %1456 = vmatmul.mubr.msk.f32.gmra.mrb[6].mxu1 %vm258_vm2, %v255_v29  ;;  %v1363_v49 = vld [vmem:[%s1680_s27 + $0xe8] sm:$0x1] }
  0x25   : > { %1498 = vmatmul.mubr.msk.f32.gmra.mrb[6].mxu0 %vm258_vm2, %v703_v30  ;;  %1460 = vmatprep.mubr.msk.f32.mxu1 %vm388_vm3, %v1683_v4  ;;  %v1351_v4 = vld [vmem:[%s1680_s27 + $0x28] sm:$0x1] }
  0x26   : > { %1502 = vmatprep.mubr.msk.f32.mxu0 %vm388_vm3, %v1693_v11 }
  0x28   : > { %1461 = vmatmul.mubr.msk.f32.vlgmr.msra.gmra.mrb[0].mxu1 %vm388_vm3, %v1693_v11  ;;  %v1014_v11 = vsel %vm231_vm1, %v238_v25, %v1013_v36  ;;  %v1023_v25 = vsel %vm231_vm1, %v247_v56, %v1022_v45 }
  0x29   : > { %1473 = vmatpush3.msra.mxu1 %v1710_v22  ;;  %1503 = vmatmul.mubr.msk.f32.vlgmr.msra.gmra.mrb[0].mxu0 %vm388_vm3, %v1701_v16  ;;  %v1010_v22 = vrot.slane %v1351_v4, 1 }
  0x2a   : > { %1515 = vmatpush3.msk.msra.mxu0 %vm275_vm0, %v1734_v35  ;;  %1463 = vmatprep.mubr.msk.f32.mxu1 %vm388_vm3, %v1701_v16  ;;  %v1364_v35 = vld [vmem:[%s1680_s27 + $0x100] sm:$0xff]  ;;  %v1025_v16 = vrot.slane %v1361_v46, 1 }
  0x2b   : > { %1505 = vmatprep.mubr.msk.f32.mxu0 %vm388_vm3, %v1725_v32  ;;  %v1011_v37 = vsel %vm231_vm1, %v235_v14, %v1010_v22  ;;  %v1017_v14 = vsel %vm231_vm1, %v241_v38, %v1016_v39  ;;  %v1365_v38 = vld [vmem:[%s1680_s27 + $0x108] sm:$0x1] }
  0x2c   : > { %1464 = vmatmul.mubr.msk.f32.gmra.mrb[2].mxu1 %vm388_vm3, %v1725_v32  ;;  %v1028_v32 = vrot.slane %v1363_v49, 1 }
  0x2d   : > { %1506 = vmatmul.mubr.msk.f32.gmra.mrb[2].mxu0 %vm388_vm3, %v1744_v41  ;;  %1466 = vmatprep.mubr.msk.f32.mxu1 %vm388_vm3, %v1744_v41  ;;  %v1031_v41 = vrot.slane %v1365_v38, 1 }
  0x2e   : > { %1508 = vmatprep.mubr.msk.f32.mxu0 %vm388_vm3, %v1755_v48 }
  0x30   : > { %1467 = vmatmul.mubr.msk.f32.gmra.mrb[4].mxu1 %vm388_vm3, %v1755_v48 }
  0x31   : > { %1509 = vmatmul.mubr.msk.f32.gmra.mrb[4].mxu0 %vm388_vm3, %v1778_v63  ;;  %1469 = vmatprep.mubr.msk.f32.mxu1 %vm388_vm3, %v1778_v63 }
  0x32   : > { %1511 = vmatprep.mubr.msk.f32.mxu0 %vm388_vm3, %v1795_v9 }
  0x34   : > { %1470 = vmatmul.mubr.msk.f32.gmra.mrb[6].mxu1 %vm388_vm3, %v1795_v9 }
  0x35   : > { %1512 = vmatmul.mubr.msk.f32.gmra.mrb[6].mxu0 %vm388_vm3, %v1364_v35  ;;  %1474 = vmatprep.mubr.msk.f32.mxu1 %vm388_vm3, %v1687_v6  ;;  %v1020_v6 = vsel %vm231_vm1, %v244_v47, %v1019_v44  ;;  %v1029_v47 = vsel %vm231_vm1, %v253_v19, %v1028_v32 }
  0x36   : > { %1516 = vmatprep.mubr.msk.f32.mxu0 %vm258_vm2, %v1011_v37 }
  0x38   : > { %1475 = vmatmul.mubr.msk.f32.vlgmr.msra.gmra.mrb[0].mxu1 %vm388_vm3, %v1698_v15  ;;  %v1030_v15 = vrot.slane %v1364_v35, 1 }
  0x39   : > { %1517 = vmatmul.mubr.msk.f32.vlgmr.msra.gmra.mrb[0].mxu0 %vm258_vm2, %v1014_v11  ;;  %1477 = vmatprep.mubr.msk.f32.mxu1 %vm388_vm3, %v1716_v27  ;;  %v1026_v27 = vsel %vm231_vm1, %v250_v5, %v1025_v16 }
  0x3a   : > { %1519 = vmatprep.mubr.msk.f32.mxu0 %vm258_vm2, %v1017_v14 }
  0x3c   : > { %1478 = vmatmul.mubr.msk.f32.gmra.mrb[2].mxu1 %vm388_vm3, %v1729_v34  ;;  %v1032_v34 = vsel %vm231_vm1, %v1030_v15, %v1031_v41 }
  0x3d   : > { %1520 = vmatmul.mubr.msk.f32.gmra.mrb[2].mxu0 %vm258_vm2, %v1020_v6  ;;  %1480 = vmatprep.mubr.msk.f32.mxu1 %vm388_vm3, %v1747_v42 }
  0x3e   : > { %1522 = vmatprep.mubr.msk.f32.mxu0 %vm258_vm2, %v1023_v25 }
  0x40   : > { %1481 = vmatmul.mubr.msk.f32.gmra.mrb[4].mxu1 %vm388_vm3, %v1768_v58 }
  0x41   : > { %1523 = vmatmul.mubr.msk.f32.gmra.mrb[4].mxu0 %vm258_vm2, %v1026_v27  ;;  %1483 = vmatprep.mubr.msk.f32.mxu1 %vm388_vm3, %v1782_v1 }
  0x42   : > { %1525 = vmatprep.mubr.msk.f32.mxu0 %vm258_vm2, %v1029_v47 }
  0x44   : > { %1484 = vmatmul.mubr.msk.f32.gmra.mrb[6].mxu1 %vm388_vm3, %v1798_v10 }
  0x45   : > { %1526 = vmatmul.mubr.msk.f32.gmra.mrb[6].mxu0 %vm258_vm2, %v1032_v34 }
 0x10b   : > { %v1476_v42 = vpop.f32.mrb[0].mxu1 }
 0x10c   : > { %v1518_v48 = vpop.f32.mrb[0].mxu0  ;;  %v625_v51 = vpop.f32.mrb[1].mxu1 }
 0x10d   : > { %v1528_v52 = vadd.f32 %v1518_v48, %v1476_v42  ;;  %v1120_v53 = vpop.f32.mrb[1].mxu0 }
 0x10e   : > { %v1529_v54 = vadd.f32 %v1120_v53, %v625_v51 }
 0x10f   : > { %v1175_v55 = vadd.f32 %v1528_v52, %v1386_v50  ;;  %v1479_v56 = vpop.f32.mrb[2].mxu1 }
 0x110   : > { %v1174_v57 = vadd.f32 %v1529_v54, %v1386_v50  ;;  %v1521_v58 = vpop.f32.mrb[2].mxu0  ;;  %v635_v59 = vpop.f32.mrb[3].mxu1 }
 0x111   : > { %v1183_v60 = vmax.f32 %v1175_v55, 0.0  ;;  %v1530_v61 = vadd.f32 %v1521_v58, %v1479_v56  ;;  %v1130_v62 = vpop.f32.mrb[3].mxu0 }
 0x112   : > { %v1182_v63 = vmax.f32 %v1174_v57, 0.0  ;;  %v1531_v0 = vadd.f32 %v1130_v62, %v635_v59 }
 0x113   : > { %1191 = vst.msk [vmem:[%s1917_s10 + $0x8] sm:$0xff] %vm388_vm3, %v1183_v60  ;;  %v1177_v1 = vadd.f32 %v1530_v61, %v1386_v50  ;;  %v1482_v2 = vpop.f32.mrb[4].mxu1 }
 0x114   : > { %1190 = vst.msk [vmem:[%s1917_s10] sm:$0xff] %vm388_vm3, %v1182_v63  ;;  %v1176_v3 = vadd.f32 %v1531_v0, %v1386_v50  ;;  %v1524_v5 = vpop.f32.mrb[4].mxu0  ;;  %v645_v7 = vpop.f32.mrb[5].mxu1 }
 0x115   : > { %v1185_v8 = vmax.f32 %v1177_v1, 0.0  ;;  %v1532_v9 = vadd.f32 %v1524_v5, %v1482_v2  ;;  %v1140_v10 = vpop.f32.mrb[5].mxu0 }
 0x116   : > { %v1184_v12 = vmax.f32 %v1176_v3, 0.0  ;;  %v1533_v13 = vadd.f32 %v1140_v10, %v645_v7 }
 0x117   : > { %1193 = vst.msk [vmem:[%s1917_s10 + $0x18] sm:$0xff] %vm388_vm3, %v1185_v8  ;;  %v1179_v17 = vadd.f32 %v1532_v9, %v1386_v50  ;;  %v1485_v18 = vpop.f32.mrb[6].mxu1 }
 0x118   : > { %1192 = vst.msk [vmem:[%s1917_s10 + $0x10] sm:$0xff] %vm388_vm3, %v1184_v12  ;;  %v1178_v19 = vadd.f32 %v1533_v13, %v1386_v50  ;;  %v1527_v20 = vpop.f32.mrb[6].mxu0  ;;  %v655_v21 = vpop.f32.mrb[7].mxu1 }
 0x119   : > { %v1187_v23 = vmax.f32 %v1179_v17, 0.0  ;;  %v1534_v24 = vadd.f32 %v1527_v20, %v1485_v18  ;;  %v1150_v26 = vpop.f32.mrb[7].mxu0 }
 0x11a   : > { %v1186_v28 = vmax.f32 %v1178_v19, 0.0  ;;  %v1535_v29 = vadd.f32 %v1150_v26, %v655_v21 }
 0x11b   : > { %1195 = vst.msk [vmem:[%s1917_s10 + $0x28] sm:$0xff] %vm388_vm3, %v1187_v23  ;;  %v1181_v30 = vadd.f32 %v1534_v24, %v1386_v50 }
 0x11c   : > { %1194 = vst.msk [vmem:[%s1917_s10 + $0x20] sm:$0xff] %vm388_vm3, %v1186_v28  ;;  %v1180_v4 = vadd.f32 %v1535_v29, %v1386_v50 }
 0x11d   : > { %v1189_v22 = vmax.f32 %v1181_v30, 0.0 }
 0x11e   : > { %v1188_v31 = vmax.f32 %v1180_v4, 0.0 }
 0x11f   : > { %1197 = vst.msk [vmem:[%s1917_s10 + $0x38] sm:$0xff] %vm388_vm3, %v1189_v22 }
 0x120   : > { %1196 = vst.msk [vmem:[%s1917_s10 + $0x30] sm:$0xff] %vm388_vm3, %v1188_v31 }
 0x121 PF: > { %s13_s14 = sadd.s32 1, %s1618_s14   ;;  %s1948_s12 = smov %s1614_s13 }
 0x122   : > { %p10_p5 = scmp.ge.s32.totalorder %s13_s14, 4   ;;  %s1949_s13 = smov %s1951_s15 }
 0x124   :  { %12 = sbr.rel (!%p10_p5) target bundleno = 2 (0x2), region = 70 }

// kernel: resnet18_conv_block.3
= control target key start
LH: loop header
LB: loop body
LE: loop exit
PB: predicated region body
PF: predicated region fallthrough
CT: control target
= control target key end

     0   :  { %s2547_s21 = smov 0   ;;  %s2549_s22 = smov 0   ;;  %s3062_s0 = inlined_call_operand.vmem [shape: f32[2,10,10,8], index: 0, kind: input, shape index: {}]   ;;  %s3063_s1 = inlined_call_operand.vmem [shape: f32[2,9,2,9,8], index: 1, kind: input, shape index: {}]   ;;  %s3064_s2 = inlined_call_operand.vmem [shape: f32[3,3,8,8], index: 2, kind: input, shape index: {}]   ;;  %s3065_s3 = inlined_call_operand.vmem [shape: f32[1,8], index: 3, kind: input, shape index: {}]   ;;  %s3066_s4 = inlined_call_operand.vmem [shape: f32[8,8], index: 4, kind: input, shape index: {}]   ;;  %s3067_s5 = inlined_call_operand.vmem [shape: f32[1,8], index: 5, kind: input, shape index: {}]   ;;  %s3068_s6 = inlined_call_operand.vmem [shape: f32[2,8,8,8], index: 6, kind: output, shape index: {}]  }
   0x1   :  { %s2551_s23 = smov 0  }
   0x2 LB: > { %s28_s24 = sadd.s32 1, %s2506_s22  ;;  %p2006_p0 = scmp.ge.s32.totalorder %s2510_s23, 1  ;;  %s2510_s23 = sphi %s2551_s23, %s16_s23   ;;  %s2506_s22 = sphi %s2549_s22, %s3070_s22   ;;  %s2502_s21 = sphi %s2547_s21, %s3069_s21  }
   0x3   : > { %p30_p1 = scmp.ge.s32.totalorder %s28_s24, 2  ;;  %p236_p2 = scmp.lt.s32.totalorder %s2510_s23, 3 }
   0x5   : > { %s3072_s24 = smov (%p30_p1, %s28_s24), 0  ;;  %p237_p3 = pnand %p2006_p0, %p236_p2 }
   0x6   : > { %v2011_v0 = vld [vmem:[%s3064_s2 + $0x8] sm:$0xff] (!%p237_p3)  ;;  %p275_p4 = scmp.lt.s32.totalorder (!%p237_p3), %s2502_s21, 1  ;;  %v314_v2 = vld [vmem:[%s3064_s2] sm:$0xff] (!%p237_p3)  ;;  %v2096_v3 = vld [vmem:[%s3064_s2 + $0x30] sm:$0xff] (!%p237_p3)  ;;  %vm331_vm0 = vcmask (!%p237_p3), 1046528   ;;  %vm358_vm1 = vcmask (!%p237_p3), 64512  }
   0x7   : > { %240 = sbr.rel (%p237_p3) target bundleno = 322 (0x142), region = 44  ;;  %v2071_v1 = vld [vmem:[%s3064_s2 + $0x28] sm:$0xff] (!%p237_p3)  ;;  %2234 = vmatprep.subr.mxu1 (!%p237_p3), %v2011_v0  ;;  %vm601_vm2 = vcmask (!%p237_p3), 1045504   ;;  %v2636_v25 = vld [vmem:[%s3064_s2 + $0x10] sm:$0xff] (!%p237_p3)  ;;  %v2655_v31 = vld [vmem:[%s3064_s2 + $0x38] sm:$0xff] (!%p237_p3) }
   0x8   : > { %2304 = vmatprep.subr.mxu0 (!%p237_p3), %v2071_v1  ;;  %2235 = vmatpush3.msra.mxu1 (!%p237_p3), %v2011_v0 }
   0x9   : > { %2305 = vmatpush3.msra.mxu0 (!%p237_p3), %v2071_v1  ;;  %2248 = vmatprep.subr.mxu1 (!%p237_p3), %v314_v2 }
   0xa   : > { %2318 = vmatprep.subr.mxu0 (!%p237_p3), %v2096_v3 }
   0xe   : > { %s3074_s21 = smov (!%p275_p4, %s2502_s21), 1 }
   0xf   : > { %s2462_s9 = smul.u32 160, %s3074_s21  ;;  %s2143_s13 = sshll.u32 %s3074_s21, 6 }
  0x10   : > { %s2463_s29 = smul.u32 288, %s3074_s21  ;;  %s3035_s16 = scalar_lea.vmem %s3068_s6, %s2143_s13 }
  0x11   : > { %s2583_s12 = scalar_lea.vmem %s3062_s0, %s2462_s9 }
  0x12   : > { %v2586_v4 = vld [vmem:[%s2583_s12] sm:$0xff]  ;;  %v2589_v5 = vld [vmem:[%s2583_s12 + $0x8] sm:$0x3]  ;;  %v2592_v6 = vld [vmem:[%s2583_s12 + $0x10] sm:$0xff]  ;;  %s2970_s8 = scalar_lea.vmem %s3063_s1, %s2463_s29 }
  0x13   : > { %v332_v7 = vrot.slane %v2586_v4, 1  ;;  %v333_v8 = vrot.slane %v2589_v5, 1  ;;  %v2597_v9 = vld [vmem:[%s2583_s12 + $0x18] sm:$0x3]  ;;  %v1078_v10 = vrot.slane %v2592_v6, 2  ;;  %v335_v13 = vrot.slane %v2592_v6, 1 }
  0x14   : > { %v1079_v11 = vrot.slane %v2597_v9, 2  ;;  %v2602_v12 = vld [vmem:[%s2583_s12 + $0x18] sm:$0x3]  ;;  %v2606_v14 = vld [vmem:[%s2583_s12 + $0x20] sm:$0xff]  ;;  %v2611_v17 = vld [vmem:[%s2583_s12 + $0x28] sm:$0x3] }
  0x15   : > { %v334_v15 = vsel %vm331_vm0, %v332_v7, %v333_v8  ;;  %v336_v16 = vrot.slane %v2602_v12, 1  ;;  %v2614_v18 = vrot.slane %v2606_v14, 1  ;;  %v2617_v19 = vld [vmem:[%s2583_s12 + $0x30] sm:$0xff]  ;;  %v2624_v21 = vrot.slane %v2606_v14, 2  ;;  %v2628_v23 = vld [vmem:[%s2583_s12 + $0x28] sm:$0x3] }
  0x16   : > { %2236 = vmatprep.mubr.msk.f32.mxu1 %vm358_vm1, %v334_v15  ;;  %v1080_v20 = vsel %vm601_vm2, %v1078_v10, %v1079_v11  ;;  %v1082_v22 = vrot.slane %v2611_v17, 2  ;;  %v2631_v24 = vld [vmem:[%s2583_s12 + $0x40] sm:$0xff]  ;;  %v339_v27 = vrot.slane %v2628_v23, 1  ;;  %v2644_v28 = vld [vmem:[%s2583_s12 + $0x38] sm:$0x3]  ;;  %v2647_v29 = vrot.slane %v2617_v19, 2 }
  0x17   : > { %2306 = vmatprep.mubr.msk.f32.mxu0 %vm358_vm1, %v1080_v20  ;;  %v337_v26 = vsel %vm331_vm0, %v335_v13, %v336_v16  ;;  %v2650_v30 = vld [vmem:[%s2583_s12 + $0x38] sm:$0x3]  ;;  %v1085_v33 = vrot.slane %v2644_v28, 2  ;;  %v2662_v34 = vrot.slane %v2617_v19, 1  ;;  %v2666_v36 = vld [vmem:[%s2583_s12 + $0x48] sm:$0x3] }
  0x18   : > { %2237 = vmatmul.mubr.msk.f32.vlgmr.msra.gmra.mrb[0].mxu1 %vm358_vm1, %v337_v26  ;;  %v1083_v32 = vsel %vm601_vm2, %v2624_v21, %v1082_v22  ;;  %v342_v35 = vrot.slane %v2650_v30, 1  ;;  %v2669_v37 = vld [vmem:[%s2583_s12 + $0x50] sm:$0xff]  ;;  %v340_v38 = vsel %vm331_vm0, %v2614_v18, %v339_v27  ;;  %v2675_v39 = vrot.slane %v2631_v24, 2  ;;  %v2679_v41 = vld [vmem:[%s2583_s12 + $0x48] sm:$0x3]  ;;  %v2685_v43 = vld [vmem:[%s2583_s12 + $0x60] sm:$0xff] }
  0x19   : > { %2249 = vmatpush3.msra.mxu1 %v314_v2  ;;  %2307 = vmatmul.mubr.msk.f32.vlgmr.msra.gmra.mrb[0].mxu0 %vm358_vm1, %v1083_v32  ;;  %v1088_v40 = vrot.slane %v2666_v36, 2  ;;  %v2682_v42 = vrot.slane %v2631_v24, 1  ;;  %v1086_v44 = vsel %vm601_vm2, %v2647_v29, %v1085_v33  ;;  %v345_v46 = vrot.slane %v2679_v41, 1  ;;  %v2694_v47 = vld [vmem:[%s2583_s12 + $0x58] sm:$0x3]  ;;  %v2714_v55 = vld [vmem:[%s2583_s12 + $0x70] sm:$0xff] }
  0x1a   : > { %2239 = vmatprep.mubr.msk.f32.mxu1 %vm358_vm1, %v340_v38  ;;  %v343_v45 = vsel %vm331_vm0, %v2662_v34, %v342_v35  ;;  %2319 = vmatpush3.msra.mxu0 %v2096_v3  ;;  %v2697_v48 = vrot.slane %v2669_v37, 2  ;;  %v2700_v49 = vld [vmem:[%s2583_s12 + $0x58] sm:$0x3]  ;;  %v1091_v51 = vrot.slane %v2694_v47, 2  ;;  %v2707_v52 = vrot.slane %v2669_v37, 1  ;;  %v2731_v61 = vld [vmem:[%s2583_s12 + $0x80] sm:$0xff] }
  0x1b   : > { %2309 = vmatprep.mubr.msk.f32.mxu0 %vm358_vm1, %v1086_v44  ;;  %v1089_v50 = vsel %vm601_vm2, %v2675_v39, %v1088_v40  ;;  %v348_v53 = vrot.slane %v2700_v49, 1  ;;  %v2711_v54 = vld [vmem:[%s2583_s12 + $0x68] sm:$0x3]  ;;  %2262 = vmatprep.subr.mxu1 %v2636_v25  ;;  %v346_v56 = vsel %vm331_vm0, %v2682_v42, %v345_v46  ;;  %v2721_v57 = vrot.slane %v2685_v43, 2  ;;  %v2742_v1 = vld [vmem:[%s2583_s12 + $0x78] sm:$0x3] }
  0x1c   : > { %2240 = vmatmul.mubr.msk.f32.gmra.mrb[2].mxu1 %vm358_vm1, %v343_v45  ;;  %v1094_v58 = vrot.slane %v2711_v54, 2  ;;  %v2725_v59 = vld [vmem:[%s2583_s12 + $0x68] sm:$0x3]  ;;  %v2728_v60 = vrot.slane %v2685_v43, 1  ;;  %2332 = vmatprep.subr.mxu0 %v2655_v31  ;;  %v1092_v62 = vsel %vm601_vm2, %v2697_v48, %v1091_v51  ;;  %v2745_v2 = vrot.slane %v2714_v55, 2  ;;  %v2053_v35 = vld [vmem:[%s3064_s2 + $0x18] sm:$0xff] }
  0x1d   : > { %2310 = vmatmul.mubr.msk.f32.gmra.mrb[2].mxu0 %vm358_vm1, %v1089_v50  ;;  %2242 = vmatprep.mubr.msk.f32.mxu1 %vm358_vm1, %v346_v56  ;;  %v349_v63 = vsel %vm331_vm0, %v2707_v52, %v348_v53  ;;  %v351_v0 = vrot.slane %v2725_v59, 1  ;;  %v2748_v3 = vld [vmem:[%s2583_s12 + $0x78] sm:$0x3]  ;;  %v1097_v8 = vrot.slane %v2742_v1, 2  ;;  %v2755_v11 = vrot.slane %v2714_v55, 1  ;;  %v2114_v38 = vld [vmem:[%s3064_s2 + $0x40] sm:$0xff] }
  0x1e   : > { %2312 = vmatprep.mubr.msk.f32.mxu0 %vm358_vm1, %v1092_v62  ;;  %v1095_v7 = vsel %vm601_vm2, %v2721_v57, %v1094_v58  ;;  %v354_v15 = vrot.slane %v2748_v3, 1  ;;  %v2759_v16 = vld [vmem:[%s2583_s12 + $0x88] sm:$0x3]  ;;  %v1099_v22 = vrot.slane %v2731_v61, 2  ;;  %v933_v40 = vrot.slane %v2666_v36, 1  ;;  %v2838_v53 = vld [vmem:[%s2583_s12 + $0x90] sm:$0xff] }
  0x1f   : > { %v352_v20 = vsel %vm331_vm0, %v2728_v60, %v351_v0  ;;  %v1100_v26 = vrot.slane %v2759_v16, 2  ;;  %v1098_v27 = vsel %vm601_vm2, %v2745_v2, %v1097_v8  ;;  %v603_v44 = vrot.slane %v2589_v5, 2  ;;  %v2819_v50 = vld [vmem:[%s2583_s12 + $0x38] sm:$0x3]  ;;  %v2824_v5 = vld [vmem:[%s2583_s12 + $0x48] sm:$0x3] }
  0x20   : > { %2243 = vmatmul.mubr.msk.f32.gmra.mrb[4].mxu1 %vm358_vm1, %v349_v63  ;;  %v355_v32 = vsel %vm331_vm0, %v2755_v11, %v354_v15  ;;  %v2814_v45 = vsel %vm331_vm0, %v2682_v42, %v933_v40  ;;  %v939_v36 = vrot.slane %v2711_v54, 1  ;;  %v606_v51 = vrot.slane %v2602_v12, 2  ;;  %v2847_v63 = vld [vmem:[%s2583_s12 + $0x58] sm:$0x3]  ;;  %v2852_v0 = vld [vmem:[%s2583_s12 + $0x68] sm:$0x3] }
  0x21   : > { %2313 = vmatmul.mubr.msk.f32.gmra.mrb[4].mxu0 %vm358_vm1, %v1095_v7  ;;  %2245 = vmatprep.mubr.msk.f32.mxu1 %vm358_vm1, %v352_v20  ;;  %v1101_v33 = vsel %vm601_vm2, %v1099_v22, %v1100_v26  ;;  %v1403_v56 = vrot.slane %v2819_v50, 1  ;;  %v609_v12 = vrot.slane %v2628_v23, 2  ;;  %v1406_v62 = vrot.slane %v2824_v5, 1  ;;  %v1735_v40 = vld [vmem:[%s3066_s4] sm:$0xff] }
  0x22   : > { %2315 = vmatprep.mubr.msk.f32.mxu0 %vm358_vm1, %v1098_v27  ;;  %v607_v23 = vsel %vm601_vm2, %v1078_v10, %v606_v51  ;;  %v612_v7 = vrot.slane %v2650_v30, 2  ;;  %v1409_v15 = vrot.slane %v2847_v63, 1  ;;  %v615_v20 = vrot.slane %v2679_v41, 2  ;;  %v2872_v10 = vld [vmem:[%s2583_s12 + $0x78] sm:$0x3] }
  0x23   : > { %v1404_v8 = vsel %vm331_vm0, %v2662_v34, %v1403_v56  ;;  %v610_v26 = vsel %vm601_vm2, %v2624_v21, %v609_v12  ;;  %v1407_v27 = vsel %vm331_vm0, %v2682_v42, %v1406_v62  ;;  %v2876_v30 = vld [vmem:[%s2583_s12 + $0x88] sm:$0x3]  ;;  %v618_v42 = vrot.slane %v2700_v49, 2 }
  0x24   : > { %2246 = vmatmul.mubr.msk.f32.gmra.mrb[6].mxu1 %vm358_vm1, %v355_v32  ;;  %v1412_v32 = vrot.slane %v2852_v0, 1  ;;  %v613_v41 = vsel %vm601_vm2, %v2647_v29, %v612_v7  ;;  %v1417_v49 = vrot.slane %v2731_v61, 1  ;;  %v1418_v51 = vrot.slane %v2876_v30, 1 }
  0x25   : > { %2316 = vmatmul.mubr.msk.f32.gmra.mrb[6].mxu0 %vm358_vm1, %v1101_v33  ;;  %2250 = vmatprep.mubr.msk.f32.mxu1 %vm358_vm1, %v2586_v4  ;;  %v2062_v33 = vld [vmem:[%s3064_s2 + $0x20] sm:$0xff]  ;;  %v624_v56 = vrot.slane %v2748_v3, 2 }
  0x26   : > { %2320 = vmatprep.mubr.msk.f32.mxu0 %vm358_vm1, %v2606_v14  ;;  %v1419_v62 = vsel %vm331_vm0, %v1417_v49, %v1418_v51 }
  0x27   : > { %v625_v3 = vsel %vm601_vm2, %v2745_v2, %v624_v56 }
  0x28   : > { %2251 = vmatmul.mubr.msk.f32.vlgmr.msra.gmra.mrb[0].mxu1 %vm358_vm1, %v2592_v6 }
  0x29   : > { %2263 = vmatpush3.msra.mxu1 %v2636_v25  ;;  %2321 = vmatmul.mubr.msk.f32.vlgmr.msra.gmra.mrb[0].mxu0 %vm358_vm1, %v2617_v19  ;;  %v2801_v25 = vld [vmem:[%s2583_s12 + $0x28] sm:$0x3] }
  0x2a   : > { %2253 = vmatprep.mubr.msk.f32.mxu1 %vm358_vm1, %v2606_v14  ;;  %2323 = vmatprep.mubr.msk.f32.mxu0 %vm358_vm1, %v2631_v24  ;;  %v1400_v46 = vrot.slane %v2801_v25, 1 }
  0x2b   : > { %2333 = vmatpush3.msra.mxu0 %v2655_v31  ;;  %2276 = vmatprep.subr.mxu1 %v2053_v35  ;;  %v602_v31 = vrot.slane %v2586_v4, 2  ;;  %v2828_v4 = vsel %vm331_vm0, %v2728_v60, %v939_v36  ;;  %v621_v36 = vrot.slane %v2725_v59, 2  ;;  %v619_v59 = vsel %vm601_vm2, %v2697_v48, %v618_v42 }
  0x2c   : > { %2254 = vmatmul.mubr.msk.f32.gmra.mrb[2].mxu1 %vm358_vm1, %v2617_v19  ;;  %2346 = vmatprep.subr.mxu0 %v2114_v38  ;;  %v1401_v58 = vsel %vm331_vm0, %v2614_v18, %v1400_v46  ;;  %v1413_v46 = vsel %vm331_vm0, %v2728_v60, %v1412_v32 }
  0x2d   : > { %2324 = vmatmul.mubr.msk.f32.gmra.mrb[2].mxu0 %vm358_vm1, %v2669_v37  ;;  %2256 = vmatprep.mubr.msk.f32.mxu1 %vm358_vm1, %v2631_v24  ;;  %v604_v54 = vsel %vm601_vm2, %v602_v31, %v603_v44  ;;  %v1410_v44 = vsel %vm331_vm0, %v2707_v52, %v1409_v15  ;;  %v1415_v31 = vrot.slane %v2872_v10, 1 }
  0x2e   : > { %2326 = vmatprep.mubr.msk.f32.mxu0 %vm358_vm1, %v2685_v43 }
  0x2f   : > { %v1416_v60 = vsel %vm331_vm0, %v2755_v11, %v1415_v31 }
  0x30   : > { %2257 = vmatmul.mubr.msk.f32.gmra.mrb[4].mxu1 %vm358_vm1, %v2669_v37 }
  0x31   : > { %2327 = vmatmul.mubr.msk.f32.gmra.mrb[4].mxu0 %vm358_vm1, %v2714_v55  ;;  %2259 = vmatprep.mubr.msk.f32.mxu1 %vm358_vm1, %v2685_v43 }
  0x32   : > { %2329 = vmatprep.mubr.msk.f32.mxu0 %vm358_vm1, %v2731_v61 }
  0x34   : > { %2260 = vmatmul.mubr.msk.f32.gmra.mrb[6].mxu1 %vm358_vm1, %v2714_v55 }
  0x35   : > { %2330 = vmatmul.mubr.msk.f32.gmra.mrb[6].mxu0 %vm358_vm1, %v2838_v53  ;;  %2264 = vmatprep.mubr.msk.f32.mxu1 %vm358_vm1, %v604_v54  ;;  %v2095_v54 = vld [vmem:[%s2583_s12 + $0x98] sm:$0x3] }
  0x36   : > { %2334 = vmatprep.mubr.msk.f32.mxu0 %vm358_vm1, %v1401_v58  ;;  %v622_v58 = vsel %vm601_vm2, %v2721_v57, %v621_v36  ;;  %v1421_v12 = vrot.slane %v2095_v54, 1 }
  0x38   : > { %2265 = vmatmul.mubr.msk.f32.vlgmr.msra.gmra.mrb[0].mxu1 %vm358_vm1, %v607_v23  ;;  %v1555_v23 = vrot.slane %v2801_v25, 2  ;;  %v1561_v25 = vrot.slane %v2824_v5, 2  ;;  %v1567_v5 = vrot.slane %v2852_v0, 2  ;;  %v1573_v0 = vrot.slane %v2876_v30, 2 }
  0x39   : > { %2277 = vmatpush3.msra.mxu1 %v2053_v35  ;;  %2335 = vmatmul.mubr.msk.f32.vlgmr.msra.gmra.mrb[0].mxu0 %vm358_vm1, %v1404_v8  ;;  %v616_v35 = vsel %vm601_vm2, %v2675_v39, %v615_v20  ;;  %v1558_v8 = vrot.slane %v2819_v50, 2  ;;  %v1564_v50 = vrot.slane %v2847_v63, 2  ;;  %v1570_v63 = vrot.slane %v2872_v10, 2 }
  0x3a   : > { %2267 = vmatprep.mubr.msk.f32.mxu1 %vm358_vm1, %v610_v26  ;;  %2337 = vmatprep.mubr.msk.f32.mxu0 %vm358_vm1, %v1407_v27  ;;  %v1556_v15 = vsel %vm601_vm2, %v2624_v21, %v1555_v23  ;;  %v1562_v21 = vsel %vm601_vm2, %v2675_v39, %v1561_v25  ;;  %v1568_v39 = vsel %vm601_vm2, %v2721_v57, %v1567_v5  ;;  %v1576_v57 = vrot.slane %v2095_v54, 2  ;;  %v2128_v26 = vld [vmem:[%s2970_s8 + $0x90] sm:$0xff] }
  0x3b   : > { %2347 = vmatpush3.msra.mxu0 %v2114_v38  ;;  %2290 = vmatprep.subr.mxu1 %v2062_v33  ;;  %v1420_v38 = vrot.slane %v2838_v53, 1  ;;  %v1559_v20 = vsel %vm601_vm2, %v2647_v29, %v1558_v8  ;;  %v1565_v29 = vsel %vm601_vm2, %v2697_v48, %v1564_v50  ;;  %v1571_v48 = vsel %vm601_vm2, %v2745_v2, %v1570_v63  ;;  %v2129_v27 = vld [vmem:[%s2970_s8 + $0xb0] sm:$0xff] }
  0x3c   : > { %2268 = vmatmul.mubr.msk.f32.gmra.mrb[2].mxu1 %vm358_vm1, %v613_v41  ;;  %2360 = vmatprep.subr.mxu0 %v1735_v40  ;;  %v930_v2 = vrot.slane %v2644_v28, 1  ;;  %v936_v28 = vrot.slane %v2694_v47, 1  ;;  %v945_v47 = vrot.slane %v2759_v16, 1  ;;  %v2131_v16 = vld [vmem:[%s2970_s8 + $0xf0] sm:$0xff] }
  0x3d   : > { %2338 = vmatmul.mubr.msk.f32.gmra.mrb[2].mxu0 %vm358_vm1, %v1410_v44  ;;  %2270 = vmatprep.mubr.msk.f32.mxu1 %vm358_vm1, %v616_v35  ;;  %v1422_v7 = vsel %vm331_vm0, %v1420_v38, %v1421_v12 }
  0x3e   : > { %2340 = vmatprep.mubr.msk.f32.mxu0 %vm358_vm1, %v1413_v46 }
  0x40   : > { %2271 = vmatmul.mubr.msk.f32.gmra.mrb[4].mxu1 %vm358_vm1, %v619_v59 }
  0x41   : > { %2341 = vmatmul.mubr.msk.f32.gmra.mrb[4].mxu0 %vm358_vm1, %v1416_v60  ;;  %2273 = vmatprep.mubr.msk.f32.mxu1 %vm358_vm1, %v622_v58 }
  0x42   : > { %2343 = vmatprep.mubr.msk.f32.mxu0 %vm358_vm1, %v1419_v62 }
  0x44   : > { %2274 = vmatmul.mubr.msk.f32.gmra.mrb[6].mxu1 %vm358_vm1, %v625_v3 }
  0x45   : > { %2344 = vmatmul.mubr.msk.f32.gmra.mrb[6].mxu0 %vm358_vm1, %v1422_v7  ;;  %2278 = vmatprep.mubr.msk.f32.mxu1 %vm358_vm1, %v2592_v6  ;;  %v2125_v6 = vld [vmem:[%s2970_s8 + $0x30] sm:$0xff] }
  0x46   : > { %2348 = vmatprep.mubr.msk.f32.mxu0 %vm358_vm1, %v1556_v15 }
  0x48   : > { %2279 = vmatmul.mubr.msk.f32.vlgmr.msra.gmra.mrb[0].mxu1 %vm358_vm1, %v2606_v14  ;;  %v924_v14 = vrot.slane %v2597_v9, 1  ;;  %v927_v9 = vrot.slane %v2611_v17, 1 }
  0x49   : > { %2291 = vmatpush3.msra.mxu1 %v2062_v33  ;;  %2349 = vmatmul.mubr.msk.f32.vlgmr.msra.gmra.mrb[0].mxu0 %vm358_vm1, %v1559_v20 }
  0x4a   : > { %2281 = vmatprep.mubr.msk.f32.mxu1 %vm358_vm1, %v2617_v19  ;;  %2351 = vmatprep.mubr.msk.f32.mxu0 %vm358_vm1, %v1562_v21  ;;  %v1575_v19 = vrot.slane %v2838_v53, 2  ;;  %v928_v17 = vsel %vm331_vm0, %v2614_v18, %v927_v9  ;;  %v2127_v18 = vld [vmem:[%s2970_s8 + $0x70] sm:$0xff]  ;;  %v937_v53 = vsel %vm331_vm0, %v2707_v52, %v936_v28 }
  0x4b   : > { %2361 = vmatpush3.msra.mxu0 %v1735_v40  ;;  %v2130_v52 = vld [vmem:[%s2970_s8 + $0xd0] sm:$0xff] }
  0x4c   : > { %2282 = vmatmul.mubr.msk.f32.gmra.mrb[2].mxu1 %vm358_vm1, %v2631_v24  ;;  %v1574_v24 = vsel %vm601_vm2, %v1099_v22, %v1573_v0  ;;  %v2124_v22 = vld [vmem:[%s2970_s8 + $0x10] sm:$0xff] }
  0x4d   : > { %2352 = vmatmul.mubr.msk.f32.gmra.mrb[2].mxu0 %vm358_vm1, %v1565_v29  ;;  %2284 = vmatprep.mubr.msk.f32.mxu1 %vm358_vm1, %v2669_v37  ;;  %v1577_v37 = vsel %vm601_vm2, %v1575_v19, %v1576_v57 }
  0x4e   : > { %2354 = vmatprep.mubr.msk.f32.mxu0 %vm358_vm1, %v1568_v39 }
  0x50   : > { %2285 = vmatmul.mubr.msk.f32.gmra.mrb[4].mxu1 %vm358_vm1, %v2685_v43  ;;  %v925_v43 = vsel %vm331_vm0, %v335_v13, %v924_v14  ;;  %v931_v13 = vsel %vm331_vm0, %v2662_v34, %v930_v2  ;;  %v942_v34 = vrot.slane %v2742_v1, 1  ;;  %v946_v1 = vsel %vm331_vm0, %v1417_v49, %v945_v47 }
  0x51   : > { %2355 = vmatmul.mubr.msk.f32.gmra.mrb[4].mxu0 %vm358_vm1, %v1571_v48  ;;  %2287 = vmatprep.mubr.msk.f32.mxu1 %vm358_vm1, %v2714_v55  ;;  %v2126_v55 = vld [vmem:[%s2970_s8 + $0x50] sm:$0xff] }
  0x52   : > { %2357 = vmatprep.mubr.msk.f32.mxu0 %vm358_vm1, %v1574_v24  ;;  %v943_v32 = vsel %vm331_vm0, %v2755_v11, %v942_v34  ;;  %v2123_v11 = vld [vmem:[%s3065_s3] ss:$0 sm:$0xff] }
  0x54   : > { %2288 = vmatmul.mubr.msk.f32.gmra.mrb[6].mxu1 %vm358_vm1, %v2731_v61  ;;  %v2132_v61 = vld [vmem:[%s3067_s5] ss:$0 sm:$0xff] }
  0x55   : > { %2358 = vmatmul.mubr.msk.f32.gmra.mrb[6].mxu0 %vm358_vm1, %v1577_v37  ;;  %2292 = vmatprep.mubr.msk.f32.mxu1 %vm358_vm1, %v925_v43 }
  0x56   : > { %2362 = vmatprep.mubr.msk.f32.mxu0 %vm358_vm1, %v2124_v22 }
  0x58   : > { %2293 = vmatmul.mubr.msk.f32.vlgmr.msra.gmra.mrb[0].mxu1 %vm358_vm1, %v928_v17 }
  0x59   : > { %2363 = vmatmul.mubr.msk.f32.vlgmr.msra.gmra.mrb[0].mxu0 %vm358_vm1, %v2125_v6  ;;  %2295 = vmatprep.mubr.msk.f32.mxu1 %vm358_vm1, %v931_v13 }
  0x5a   : > { %2365 = vmatprep.mubr.msk.f32.mxu0 %vm358_vm1, %v2126_v55 }
  0x5c   : > { %2296 = vmatmul.mubr.msk.f32.gmra.mrb[2].mxu1 %vm358_vm1, %v2814_v45 }
  0x5d   : > { %2366 = vmatmul.mubr.msk.f32.gmra.mrb[2].mxu0 %vm358_vm1, %v2127_v18  ;;  %2298 = vmatprep.mubr.msk.f32.mxu1 %vm358_vm1, %v937_v53 }
  0x5e   : > { %2368 = vmatprep.mubr.msk.f32.mxu0 %vm358_vm1, %v2128_v26 }
  0x60   : > { %2299 = vmatmul.mubr.msk.f32.gmra.mrb[4].mxu1 %vm358_vm1, %v2828_v4 }
  0x61   : > { %2369 = vmatmul.mubr.msk.f32.gmra.mrb[4].mxu0 %vm358_vm1, %v2129_v27  ;;  %2301 = vmatprep.mubr.msk.f32.mxu1 %vm358_vm1, %v943_v32 }
  0x62   : > { %2371 = vmatprep.mubr.msk.f32.mxu0 %vm358_vm1, %v2130_v52 }
  0x64   : > { %2302 = vmatmul.mubr.msk.f32.gmra.mrb[6].mxu1 %vm358_vm1, %v946_v1 }
  0x65   : > { %2372 = vmatmul.mubr.msk.f32.gmra.mrb[6].mxu0 %vm358_vm1, %v2131_v16 }
 0x12b   : > { %v2294_v45 = vpop.f32.mrb[0].mxu1 }
 0x12c   : > { %v2374_v4 = vadd.f32 %v2294_v45, %v2123_v11  ;;  %v2364_v10 = vpop.f32.mrb[0].mxu0  ;;  %v1031_v30 = vpop.f32.mrb[1].mxu1 }
 0x12d   : > { %v2377_v33 = vadd.f32 %v2123_v11, %v1031_v30  ;;  %v1833_v41 = vpop.f32.mrb[1].mxu0 }
 0x12e   : > { %v2375_v42 = vadd.f32 %v2374_v4, %v2364_v10 }
 0x12f   : > { %v2378_v40 = vadd.f32 %v2377_v33, %v1833_v41  ;;  %v2297_v44 = vpop.f32.mrb[2].mxu1 }
 0x130   : > { %v2376_v35 = vadd.f32 %v2375_v42, %v2132_v61  ;;  %v2380_v31 = vadd.f32 %v2297_v44, %v2123_v11  ;;  %v2367_v36 = vpop.f32.mrb[2].mxu0  ;;  %v1041_v49 = vpop.f32.mrb[3].mxu1 }
 0x131   : > { %v2379_v46 = vadd.f32 %v2378_v40, %v2132_v61  ;;  %v2383_v51 = vadd.f32 %v2123_v11, %v1041_v49  ;;  %v1843_v54 = vpop.f32.mrb[3].mxu0 }
 0x132   : > { %v1881_v59 = vmax.f32 %v2376_v35, 0.0  ;;  %v2381_v56 = vadd.f32 %v2380_v31, %v2132_v61 }
 0x133   : > { %v1880_v38 = vmax.f32 %v2379_v46, 0.0  ;;  %v2384_v60 = vadd.f32 %v2383_v51, %v2132_v61  ;;  %v2300_v58 = vpop.f32.mrb[4].mxu1 }
 0x134   : > { %1889 = vst.msk [vmem:[%s3035_s16 + $0x8] sm:$0xff] %vm358_vm1, %v1881_v59  ;;  %v2382_v12 = vadd.f32 %v2381_v56, %v2367_v36  ;;  %v2386_v62 = vadd.f32 %v2300_v58, %v2123_v11  ;;  %v2370_v23 = vpop.f32.mrb[4].mxu0  ;;  %v1051_v3 = vpop.f32.mrb[5].mxu1 }
 0x135   : > { %1888 = vst.msk [vmem:[%s3035_s16] sm:$0xff] %vm358_vm1, %v1880_v38  ;;  %v2385_v7 = vadd.f32 %v2384_v60, %v1843_v54  ;;  %v2389_v8 = vadd.f32 %v2123_v11, %v1051_v3  ;;  %v1853_v15 = vpop.f32.mrb[5].mxu0 }
 0x136   : > { %v1883_v25 = vmax.f32 %v2382_v12, 0.0  ;;  %v2387_v20 = vadd.f32 %v2386_v62, %v2132_v61 }
 0x137   : > { %v1882_v50 = vmax.f32 %v2385_v7, 0.0  ;;  %v2390_v21 = vadd.f32 %v2389_v8, %v2132_v61  ;;  %v2303_v5 = vpop.f32.mrb[6].mxu1 }
 0x138   : > { %1891 = vst.msk [vmem:[%s3035_s16 + $0x18] sm:$0xff] %vm358_vm1, %v1883_v25  ;;  %v2388_v29 = vadd.f32 %v2387_v20, %v2370_v23  ;;  %v2392_v63 = vadd.f32 %v2303_v5, %v2123_v11  ;;  %v2373_v39 = vpop.f32.mrb[6].mxu0  ;;  %v1061_v0 = vpop.f32.mrb[7].mxu1 }
 0x139   : > { %1890 = vst.msk [vmem:[%s3035_s16 + $0x10] sm:$0xff] %vm358_vm1, %v1882_v50  ;;  %v2391_v14 = vadd.f32 %v2390_v21, %v1853_v15  ;;  %v2395_v19 = vadd.f32 %v2123_v11, %v1061_v0  ;;  %v1863_v48 = vpop.f32.mrb[7].mxu0 }
 0x13a   : > { %v1885_v57 = vmax.f32 %v2388_v29, 0.0  ;;  %v2393_v24 = vadd.f32 %v2392_v63, %v2132_v61 }
 0x13b   : > { %v1884_v9 = vmax.f32 %v2391_v14, 0.0  ;;  %v2396_v37 = vadd.f32 %v2395_v19, %v2132_v61 }
 0x13c   : > { %1893 = vst.msk [vmem:[%s3035_s16 + $0x28] sm:$0xff] %vm358_vm1, %v1885_v57  ;;  %v2394_v43 = vadd.f32 %v2393_v24, %v2373_v39 }
 0x13d   : > { %1892 = vst.msk [vmem:[%s3035_s16 + $0x20] sm:$0xff] %vm358_vm1, %v1884_v9  ;;  %v2397_v2 = vadd.f32 %v2396_v37, %v1863_v48 }
 0x13e   : > { %v1887_v22 = vmax.f32 %v2394_v43, 0.0 }
 0x13f   : > { %v1886_v17 = vmax.f32 %v2397_v2, 0.0 }
 0x140   : > { %1895 = vst.msk [vmem:[%s3035_s16 + $0x38] sm:$0xff] %vm358_vm1, %v1887_v22 }
 0x141   : > { %1894 = vst.msk [vmem:[%s3035_s16 + $0x30] sm:$0xff] %vm358_vm1, %v1886_v17 }
 0x142 PF: > { %s16_s23 = sadd.s32 1, %s2510_s23   ;;  %s3069_s21 = smov %s2506_s22 }
 0x143   : > { %p13_p5 = scmp.ge.s32.totalorder %s16_s23, 4   ;;  %s3070_s22 = smov %s3072_s24 }
 0x145   :  { %15 = sbr.rel (!%p13_p5) target bundleno = 2 (0x2), region = 89 }

</bundles_post_ra>
